<compile_context>
chip_gen: v7x
topology: tpu7x:2x2x1
jax: 0.10.0
libtpu: 0.0.40
codegen_flags: <defaults>
</compile_context>

<pallas_src>
import functools

import jax
import jax.numpy as jnp
from jax.experimental import pallas as pl
from jax.experimental.pallas import tpu as pltpu

# ---------------- small ChatGLM-style config ----------------
S = 16                     # number of tokens (flattened seq), full bf16 sublane tile
HIDDEN = 128               # config.hidden_size
NUM_HEADS = 4              # config.num_attention_heads
HEAD_DIM = HIDDEN // NUM_HEADS          # 32
NUM_KV_HEADS = 2           # config.multi_query_group_num (multi_query_attention=True)
Q_SIZE = NUM_HEADS * HEAD_DIM           # 128
KV_SIZE = NUM_KV_HEADS * HEAD_DIM       # 64
QKV_SIZE = Q_SIZE + 2 * KV_SIZE         # 256
FFN = 256                  # config.ffn_hidden_size
NUM_LAYERS = 2             # config.num_layers
VOCAB = 256                # config.padded_vocab_size
EPS = 1e-5                 # config.layernorm_epsilon
ROTARY_DIM = HEAD_DIM // 2              # rotary_dim = head_dim // 2
ROPE_BASE = 10000.0                     # base = 10000 * rope_ratio (rope_ratio=1.0)
SCALE = HEAD_DIM ** -0.5


# ---------------- fused whole-model Pallas kernel ----------------
def _glm_stack_kernel(
    h_in_ref,        # (S, H)            bf16   initial embeddings
    ln_ref,          # (1, 2, H)         f32    [input_ln, post_ln] for this layer
    qkv_w_ref,       # (1, H, QKV)       bf16   merged QKV weight for this layer
    qkv_b_ref,       # (1, 1, QKV)       f32    merged QKV bias
    dense_w_ref,     # (1, Q_SIZE, H)    bf16   attention output projection
    w1_ref,          # (1, H, 2*FFN)     bf16   dense_h_to_4h (merged gate/up)
    w2_ref,          # (1, FFN, H)       bf16   dense_4h_to_h
    rope_ref,        # (2, S, QKV)       f32    [cos, signed sin] (identity on passthrough & V)
    final_ln_ref,    # (1, H)            f32    final_layernorm weight
    o_ref,           # (S, H)            bf16   output hidden states
    h_sc,            # (S, H)            f32    VMEM scratch: resident residual stream
    *, num_heads, num_kv_heads, head_dim, q_size, kv_size, ffn, scale, eps,
):
    layer = pl.program_id(0)
    num_layers = pl.num_programs(0)

    @pl.when(layer == 0)
    def _():
        h_sc[...] = h_in_ref[...].astype(jnp.float32)

    h = h_sc[...]                                        # (S, H) f32 residual

    def rmsnorm(x, w):                                   # f32 VPU math (also the v5e-safe path)
        var = jnp.mean(x * x, axis=-1, keepdims=True)
        return x * jax.lax.rsqrt(var + eps) * w

    ln_w = ln_ref[0]                                     # (2, H)

    # ---------------- attention half: RMSNorm -> merged QKV -> RoPE -> MQA -> dense -> residual
    ln1 = rmsnorm(h, ln_w[0:1, :])                       # (S, H)
    qkv = jnp.dot(ln1.astype(jnp.bfloat16), qkv_w_ref[0],
                  preferred_element_type=jnp.float32) + qkv_b_ref[0]        # (S, QKV) f32

    # Interleaved (is_neox_style=False) RoPE on the whole QKV slab, element-wise:
    #   out = x*cos + pair_swap(x)*sin_signed, with cos=1/sin=0 on the pass-through half and on V.
    # pair_swap(x)[:, 2i] = x[:, 2i+1], pair_swap(x)[:, 2i+1] = x[:, 2i]  (two XLU lane rolls).
    cos = rope_ref[0]                                    # (S, QKV)
    sin = rope_ref[1]                                    # (S, QKV), carries the (-sin, +sin) signs
    n_lanes = qkv.shape[-1]
    fwd = pltpu.roll(qkv, shift=1, axis=1)               # out[:, j] = qkv[:, j-1]
    bwd = pltpu.roll(qkv, shift=n_lanes - 1, axis=1)     # out[:, j] = qkv[:, j+1]
    lane = jax.lax.broadcasted_iota(jnp.int32, qkv.shape, 1)
    swapped = jnp.where((lane & 1) == 0, bwd, fwd)       # partner lane within each pair
    qkv = qkv * cos + swapped * sin

    q = qkv[:, :q_size].astype(jnp.bfloat16)                       # (S, Hq*D)
    k = qkv[:, q_size:q_size + kv_size].astype(jnp.bfloat16)       # (S, Hkv*D)
    v = qkv[:, q_size + kv_size:].astype(jnp.bfloat16)             # (S, Hkv*D)

    group = num_heads // num_kv_heads
    q_h = jnp.stack([q[:, hd * head_dim:(hd + 1) * head_dim]
                     for hd in range(num_heads)], axis=0)           # (H, S, D)
    k_h = jnp.stack([k[:, (hd // group) * head_dim:((hd // group) + 1) * head_dim]
                     for hd in range(num_heads)], axis=0)           # (H, S, D)  (KV broadcast)
    v_h = jnp.stack([v[:, (hd // group) * head_dim:((hd // group) + 1) * head_dim]
                     for hd in range(num_heads)], axis=0)           # (H, S, D)

    s_tok = h.shape[0]
    row = jax.lax.broadcasted_iota(jnp.int32, (s_tok, s_tok), 0)
    col = jax.lax.broadcasted_iota(jnp.int32, (s_tok, s_tok), 1)
    causal = (col <= row)[None, :, :]

    sc = jnp.einsum('hqd,hkd->hqk', q_h, k_h,
                    preferred_element_type=jnp.float32) * scale     # (H, S, S) f32
    sc = jnp.where(causal, sc, -1e30)
    sc = sc - jnp.max(sc, axis=-1, keepdims=True)
    p = jnp.exp(sc)
    p = p / jnp.sum(p, axis=-1, keepdims=True)                      # exact softmax (parity)
    ctx = jnp.einsum('hqk,hkd->hqd', p.astype(jnp.bfloat16), v_h,
                     preferred_element_type=jnp.float32)            # (H, S, D)
    ctx_flat = jnp.concatenate([ctx[hd] for hd in range(num_heads)], axis=-1)   # (S, Q_SIZE)

    attn = jnp.dot(ctx_flat.astype(jnp.bfloat16), dense_w_ref[0],
                   preferred_element_type=jnp.float32)              # (S, H), K=128 dense dot
    h = h + attn                                                    # residual = pre-LN h

    # ---------------- MLP half: RMSNorm -> dense_h_to_4h -> SiluAndMul -> dense_4h_to_h -> residual
    ln2 = rmsnorm(h, ln_w[1:2, :])
    inter = jnp.dot(ln2.astype(jnp.bfloat16), w1_ref[0],
                    preferred_element_type=jnp.float32)             # (S, 2*FFN)
    gate = inter[:, :ffn]
    up = inter[:, ffn:]
    act = gate * jax.nn.sigmoid(gate) * up                          # SiluAndMul in f32
    mlp = jnp.dot(act.astype(jnp.bfloat16), w2_ref[0],
                  preferred_element_type=jnp.float32)               # (S, H)
    h = h + mlp

    h_sc[...] = h                                                   # carry residual to next layer
    o_ref[...] = h.astype(o_ref.dtype)

    @pl.when(layer == num_layers - 1)
    def _():                                                        # fold final_layernorm in
        o_ref[...] = rmsnorm(h, final_ln_ref[...]).astype(o_ref.dtype)


# ---------------- wrapper ----------------
def chatglm_layers(h, params, rope_tab):
    kernel = functools.partial(
        _glm_stack_kernel,
        num_heads=NUM_HEADS, num_kv_heads=NUM_KV_HEADS, head_dim=HEAD_DIM,
        q_size=Q_SIZE, kv_size=KV_SIZE, ffn=FFN, scale=SCALE, eps=EPS)

    in_specs = [
        pl.BlockSpec((S, HIDDEN), lambda l: (0, 0)),                    # h (step-0 init only)
        pl.BlockSpec((1, 2, HIDDEN), lambda l: (l, 0, 0)),              # [input_ln, post_ln]
        pl.BlockSpec((1, HIDDEN, QKV_SIZE), lambda l: (l, 0, 0)),       # merged QKV weight
        pl.BlockSpec((1, 1, QKV_SIZE), lambda l: (l, 0, 0)),            # merged QKV bias
        pl.BlockSpec((1, Q_SIZE, HIDDEN), lambda l: (l, 0, 0)),         # dense
        pl.BlockSpec((1, HIDDEN, 2 * FFN), lambda l: (l, 0, 0)),        # dense_h_to_4h
        pl.BlockSpec((1, FFN, HIDDEN), lambda l: (l, 0, 0)),            # dense_4h_to_h
        pl.BlockSpec((2, S, QKV_SIZE), lambda l: (0, 0, 0)),            # [cos, sin] RoPE table
        pl.BlockSpec((1, HIDDEN), lambda l: (0, 0)),                    # final layernorm weight
    ]
    out_specs = pl.BlockSpec((S, HIDDEN), lambda l: (0, 0))             # resident across layers

    return pl.pallas_call(
        kernel,
        grid_spec=pltpu.PrefetchScalarGridSpec(
            num_scalar_prefetch=0,
            grid=(NUM_LAYERS,),
            in_specs=in_specs,
            out_specs=out_specs,
            scratch_shapes=[pltpu.VMEM((S, HIDDEN), jnp.float32)],
        ),
        out_shape=jax.ShapeDtypeStruct((S, HIDDEN), jnp.bfloat16),
        compiler_params=pltpu.CompilerParams(dimension_semantics=("arbitrary",)),
        input_output_aliases={0: 0},
    )(h, params["ln_w"], params["qkv_w"], params["qkv_b"], params["dense_w"],
      params["w1"], params["w2"], rope_tab, params["final_ln"])


# ---------------- JAX glue (RoPE tables, embedding gather, weight prep) ----------------
def rope_tables(positions):
    """(2, S, QKV) table: row 0 = cos, row 1 = signed sin (identity on pass-through half and V)."""
    rd = ROTARY_DIM
    n = positions.shape[0]
    inv_freq = 1.0 / (ROPE_BASE ** (jnp.arange(0, rd, 2, dtype=jnp.float32) / rd))
    freqs = positions.astype(jnp.float32)[:, None] * inv_freq[None, :]          # (S, rd/2)
    cos = jnp.repeat(jnp.cos(freqs), 2, axis=1)                                 # (S, rd)
    sin = jnp.repeat(jnp.sin(freqs), 2, axis=1)                                 # (S, rd)
    sign = jnp.tile(jnp.array([-1.0, 1.0], jnp.float32), rd // 2)               # (-sin, +sin)
    sin = sin * sign[None, :]
    cos_h = jnp.concatenate([cos, jnp.ones((n, HEAD_DIM - rd), jnp.float32)], axis=1)   # (S, D)
    sin_h = jnp.concatenate([sin, jnp.zeros((n, HEAD_DIM - rd), jnp.float32)], axis=1)  # (S, D)
    cos_full = jnp.concatenate(
        [jnp.tile(cos_h, (1, NUM_HEADS)), jnp.tile(cos_h, (1, NUM_KV_HEADS)),
         jnp.ones((n, KV_SIZE), jnp.float32)], axis=1)                          # (S, QKV)
    sin_full = jnp.concatenate(
        [jnp.tile(sin_h, (1, NUM_HEADS)), jnp.tile(sin_h, (1, NUM_KV_HEADS)),
         jnp.zeros((n, KV_SIZE), jnp.float32)], axis=1)                         # (S, QKV)
    return jnp.stack([cos_full, sin_full], axis=0)                              # (2, S, QKV)


def chatglm_forward(params, input_ids, positions):
    # VocabParallelEmbedding gather kept in plain JAX (glue).
    h = params["embedding"][input_ids]                         # (S, HIDDEN) bf16
    rope_tab = rope_tables(positions)
    # Whole GLMTransformer (all layers + final_layernorm) in one pipelined pallas_call.
    return chatglm_layers(h, params, rope_tab)


def init_params(key):
    def w(k, shape, scale_=0.02):
        return jax.random.normal(k, shape, dtype=jnp.float32) * scale_

    keys = jax.random.split(key, 2)
    lkeys = jax.random.split(keys[1], NUM_LAYERS)
    qkv_w, qkv_b, dense_w, w1, w2, ln_w = [], [], [], [], [], []
    for i in range(NUM_LAYERS):
        lk = jax.random.split(lkeys[i], 5)
        qkv_w.append(w(lk[0], (HIDDEN, QKV_SIZE)))              # add_qkv_bias=True
        qkv_b.append(w(lk[1], (1, QKV_SIZE)))
        dense_w.append(w(lk[2], (Q_SIZE, HIDDEN)))              # add_bias_linear=False
        w1.append(w(lk[3], (HIDDEN, 2 * FFN)))                  # dense_h_to_4h (merged gate/up)
        w2.append(w(lk[4], (FFN, HIDDEN)))                      # dense_4h_to_h
        ln_w.append(jnp.ones((2, HIDDEN), jnp.float32))         # [input_ln, post_ln]
    return {
        "embedding": w(keys[0], (VOCAB, HIDDEN)).astype(jnp.bfloat16),
        "final_ln": jnp.ones((1, HIDDEN), jnp.float32),
        "ln_w": jnp.stack(ln_w),                                # (L, 2, H)       f32
        "qkv_w": jnp.stack(qkv_w).astype(jnp.bfloat16),         # (L, H, QKV)     bf16
        "qkv_b": jnp.stack(qkv_b),                              # (L, 1, QKV)     f32
        "dense_w": jnp.stack(dense_w).astype(jnp.bfloat16),     # (L, Q_SIZE, H)  bf16
        "w1": jnp.stack(w1).astype(jnp.bfloat16),               # (L, H, 2*FFN)   bf16
        "w2": jnp.stack(w2).astype(jnp.bfloat16),               # (L, FFN, H)     bf16
    }


if __name__ == "__main__":
    key = jax.random.PRNGKey(0)
    pkey, ikey = jax.random.split(key)
    params = init_params(pkey)
    input_ids = jax.random.randint(ikey, (S,), 0, VOCAB, dtype=jnp.int32)
    positions = jnp.arange(S, dtype=jnp.int32)

    out = jax.jit(chatglm_forward)(params, input_ids, positions)
    out = jax.block_until_ready(out)
    assert out.shape == (S, HIDDEN)
    print("KERNEL_OK")
</pallas_src>

<mosaic_0001>
module attributes {stable_mosaic.version = 11 : i64} {
  func.func @_glm_stack_kernel(%arg0: i32, %arg1: memref<16x128xbf16, #tpu.memory_space<vmem>>, %arg2: memref<1x2x128xf32, #tpu.memory_space<vmem>>, %arg3: memref<1x128x256xbf16, #tpu.memory_space<vmem>>, %arg4: memref<1x1x256xf32, #tpu.memory_space<vmem>>, %arg5: memref<1x128x128xbf16, #tpu.memory_space<vmem>>, %arg6: memref<1x128x512xbf16, #tpu.memory_space<vmem>>, %arg7: memref<1x256x128xbf16, #tpu.memory_space<vmem>>, %arg8: memref<2x16x256xf32, #tpu.memory_space<vmem>>, %arg9: memref<1x128xf32, #tpu.memory_space<vmem>>, %arg10: memref<16x128xbf16, #tpu.memory_space<vmem>>, %arg11: memref<16x128xf32, #tpu.memory_space<vmem>>) attributes {dimension_semantics = [#tpu.dimension_semantics<arbitrary>], iteration_bounds = array<i64: 2>, scalar_prefetch = 0 : i64, scratch_operands = 1 : i64, tpu.core_type = #tpu.core_type<tc>, window_params = [{pipeline_mode = #tpu.pipeline_mode<synchronous>, transform_indices = @transform_0, window_bounds = array<i64: 16, 128>}, {transform_indices = @transform_1, window_bounds = array<i64: 1, 2, 128>}, {transform_indices = @transform_2, window_bounds = array<i64: 1, 128, 256>}, {transform_indices = @transform_3, window_bounds = array<i64: 1, 1, 256>}, {transform_indices = @transform_4, window_bounds = array<i64: 1, 128, 128>}, {transform_indices = @transform_5, window_bounds = array<i64: 1, 128, 512>}, {transform_indices = @transform_6, window_bounds = array<i64: 1, 256, 128>}, {pipeline_mode = #tpu.pipeline_mode<synchronous>, transform_indices = @transform_7, window_bounds = array<i64: 2, 16, 256>}, {pipeline_mode = #tpu.pipeline_mode<synchronous>, transform_indices = @transform_8, window_bounds = array<i64: 1, 128>}, {pipeline_mode = #tpu.pipeline_mode<synchronous>, transform_indices = @transform_9, window_bounds = array<i64: 16, 128>}]} {
    %c0_i32 = arith.constant 0 : i32
    %0 = arith.cmpi eq, %arg0, %c0_i32 : i32
    %1 = arith.extui %0 : i1 to i32
    %c0_i32_0 = arith.constant 0 : i32
    %2 = arith.cmpi ne, %1, %c0_i32_0 : i32
    scf.if %2 {
      %c0_49 = arith.constant 0 : index
      %c0_50 = arith.constant 0 : index
      %148 = vector.load %arg1[%c0_49, %c0_50] : memref<16x128xbf16, #tpu.memory_space<vmem>>, vector<16x128xbf16>
      %149 = arith.extf %148 : vector<16x128xbf16> to vector<16x128xf32>
      %c0_51 = arith.constant 0 : index
      %c0_52 = arith.constant 0 : index
      %150 = vector.load %arg11[%c0_51, %c0_52] : memref<16x128xf32, #tpu.memory_space<vmem>>, vector<16x128xf32>
      tpu.vector_store %arg11[%c0_51, %c0_52], %149 {strides = array<i32>} : memref<16x128xf32, #tpu.memory_space<vmem>>, vector<16x128xf32>,
    } else {
    }
    %c0 = arith.constant 0 : index
    %c0_1 = arith.constant 0 : index
    %3 = vector.load %arg11[%c0, %c0_1] : memref<16x128xf32, #tpu.memory_space<vmem>>, vector<16x128xf32>
    %c0_2 = arith.constant 0 : index
    %c0_3 = arith.constant 0 : index
    %c0_4 = arith.constant 0 : index
    %4 = vector.load %arg2[%c0_2, %c0_3, %c0_4] : memref<1x2x128xf32, #tpu.memory_space<vmem>>, vector<1x2x128xf32>
    %5 = vector.shape_cast %4 : vector<1x2x128xf32> to vector<2x128xf32>
    %6 = vector.extract_strided_slice %5 {offsets = [0, 0], sizes = [1, 128], strides = [1, 1]} : vector<2x128xf32> to vector<1x128xf32>
    %7 = arith.mulf %3, %3 : vector<16x128xf32>
    %cst = arith.constant dense<0.000000e+00> : vector<16xf32>
    %8 = vector.multi_reduction <add>, %7, %cst [1] : vector<16x128xf32> to vector<16xf32>
    %9 = vector.shape_cast %8 : vector<16xf32> to vector<16x1xf32>
    %cst_5 = arith.constant 1.280000e+02 : f32
    %10 = vector.broadcast %cst_5 : f32 to vector<16x1xf32>
    %11 = arith.divf %9, %10 : vector<16x1xf32>
    %cst_6 = arith.constant 9.99999974E-6 : f32
    %12 = vector.broadcast %cst_6 : f32 to vector<16x1xf32>
    %13 = arith.addf %11, %12 : vector<16x1xf32>
    %14 = math.rsqrt %13 : vector<16x1xf32>
    %15 = vector.broadcast %14 : vector<16x1xf32> to vector<16x128xf32>
    %16 = arith.mulf %3, %15 : vector<16x128xf32>
    %17 = vector.broadcast %6 : vector<1x128xf32> to vector<16x128xf32>
    %18 = arith.mulf %16, %17 : vector<16x128xf32>
    %19 = arith.truncf %18 : vector<16x128xf32> to vector<16x128xbf16>
    %c0_7 = arith.constant 0 : index
    %c0_8 = arith.constant 0 : index
    %c0_9 = arith.constant 0 : index
    %20 = vector.load %arg3[%c0_7, %c0_8, %c0_9] : memref<1x128x256xbf16, #tpu.memory_space<vmem>>, vector<1x128x256xbf16>
    %21 = vector.shape_cast %20 : vector<1x128x256xbf16> to vector<128x256xbf16>
    %cst_10 = arith.constant dense<0.000000e+00> : vector<16x256xf32>
    %22 = tpu.matmul %19, %21, %cst_10 {dimension_numbers = #tpu.dot_dimension_numbers<[1], [0], [0], [1], [0, 0, 1, 1], [], []>} : vector<16x128xbf16>, vector<128x256xbf16>, vector<16x256xf32> -> vector<16x256xf32>
    %c0_11 = arith.constant 0 : index
    %c0_12 = arith.constant 0 : index
    %c0_13 = arith.constant 0 : index
    %23 = vector.load %arg4[%c0_11, %c0_12, %c0_13] : memref<1x1x256xf32, #tpu.memory_space<vmem>>, vector<1x1x256xf32>
    %24 = vector.shape_cast %23 : vector<1x1x256xf32> to vector<1x256xf32>
    %25 = vector.broadcast %24 : vector<1x256xf32> to vector<16x256xf32>
    %26 = arith.addf %22, %25 : vector<16x256xf32>
    %c0_14 = arith.constant 0 : index
    %c0_15 = arith.constant 0 : index
    %c0_16 = arith.constant 0 : index
    %27 = vector.load %arg8[%c0_14, %c0_15, %c0_16] : memref<2x16x256xf32, #tpu.memory_space<vmem>>, vector<1x16x256xf32>
    %28 = vector.shape_cast %27 : vector<1x16x256xf32> to vector<16x256xf32>
    %c1 = arith.constant 1 : index
    %c0_17 = arith.constant 0 : index
    %c0_18 = arith.constant 0 : index
    %29 = vector.load %arg8[%c1, %c0_17, %c0_18] : memref<2x16x256xf32, #tpu.memory_space<vmem>>, vector<1x16x256xf32>
    %30 = vector.shape_cast %29 : vector<1x16x256xf32> to vector<16x256xf32>
    %c1_i32 = arith.constant 1 : i32
    %31 = tpu.dynamic_rotate %26 by %c1_i32 dim 1 : vector<16x256xf32>, i32 -> vector<16x256xf32>
    %c255_i32 = arith.constant 255 : i32
    %32 = tpu.dynamic_rotate %26 by %c255_i32 dim 1 : vector<16x256xf32>, i32 -> vector<16x256xf32>
    %33 = tpu.iota {dimensions = array<i32: 1>} : vector<16x256xi32>
    %c1_i32_19 = arith.constant 1 : i32
    %34 = vector.broadcast %c1_i32_19 : i32 to vector<16x256xi32>
    %35 = arith.andi %33, %34 : vector<16x256xi32>
    %c0_i32_20 = arith.constant 0 : i32
    %36 = vector.broadcast %c0_i32_20 : i32 to vector<16x256xi32>
    %37 = arith.cmpi eq, %35, %36 : vector<16x256xi32>
    %38 = arith.select %37, %32, %31 : vector<16x256xi1>, vector<16x256xf32>
    %39 = arith.mulf %26, %28 : vector<16x256xf32>
    %40 = arith.mulf %38, %30 : vector<16x256xf32>
    %41 = arith.addf %39, %40 : vector<16x256xf32>
    %42 = vector.extract_strided_slice %41 {offsets = [0, 0], sizes = [16, 128], strides = [1, 1]} : vector<16x256xf32> to vector<16x128xf32>
    %43 = arith.truncf %42 : vector<16x128xf32> to vector<16x128xbf16>
    %44 = vector.extract_strided_slice %41 {offsets = [0, 128], sizes = [16, 64], strides = [1, 1]} : vector<16x256xf32> to vector<16x64xf32>
    %45 = arith.truncf %44 : vector<16x64xf32> to vector<16x64xbf16>
    %46 = vector.extract_strided_slice %41 {offsets = [0, 192], sizes = [16, 64], strides = [1, 1]} : vector<16x256xf32> to vector<16x64xf32>
    %47 = arith.truncf %46 : vector<16x64xf32> to vector<16x64xbf16>
    %48 = vector.extract_strided_slice %43 {offsets = [0, 0], sizes = [16, 32], strides = [1, 1]} : vector<16x128xbf16> to vector<16x32xbf16>
    %49 = vector.extract_strided_slice %43 {offsets = [0, 32], sizes = [16, 32], strides = [1, 1]} : vector<16x128xbf16> to vector<16x32xbf16>
    %50 = vector.extract_strided_slice %43 {offsets = [0, 64], sizes = [16, 32], strides = [1, 1]} : vector<16x128xbf16> to vector<16x32xbf16>
    %51 = vector.extract_strided_slice %43 {offsets = [0, 96], sizes = [16, 32], strides = [1, 1]} : vector<16x128xbf16> to vector<16x32xbf16>
    %52 = vector.shape_cast %48 : vector<16x32xbf16> to vector<1x16x32xbf16>
    %53 = vector.shape_cast %49 : vector<16x32xbf16> to vector<1x16x32xbf16>
    %54 = vector.shape_cast %50 : vector<16x32xbf16> to vector<1x16x32xbf16>
    %55 = vector.shape_cast %51 : vector<16x32xbf16> to vector<1x16x32xbf16>
    %56 = tpu.concatenate %52, %53, %54, %55 in 0 : vector<1x16x32xbf16>, vector<1x16x32xbf16>, vector<1x16x32xbf16>, vector<1x16x32xbf16> -> vector<4x16x32xbf16>
    %57 = vector.extract_strided_slice %45 {offsets = [0, 0], sizes = [16, 32], strides = [1, 1]} : vector<16x64xbf16> to vector<16x32xbf16>
    %58 = vector.extract_strided_slice %45 {offsets = [0, 0], sizes = [16, 32], strides = [1, 1]} : vector<16x64xbf16> to vector<16x32xbf16>
    %59 = vector.extract_strided_slice %45 {offsets = [0, 32], sizes = [16, 32], strides = [1, 1]} : vector<16x64xbf16> to vector<16x32xbf16>
    %60 = vector.extract_strided_slice %45 {offsets = [0, 32], sizes = [16, 32], strides = [1, 1]} : vector<16x64xbf16> to vector<16x32xbf16>
    %61 = vector.shape_cast %57 : vector<16x32xbf16> to vector<1x16x32xbf16>
    %62 = vector.shape_cast %58 : vector<16x32xbf16> to vector<1x16x32xbf16>
    %63 = vector.shape_cast %59 : vector<16x32xbf16> to vector<1x16x32xbf16>
    %64 = vector.shape_cast %60 : vector<16x32xbf16> to vector<1x16x32xbf16>
    %65 = tpu.concatenate %61, %62, %63, %64 in 0 : vector<1x16x32xbf16>, vector<1x16x32xbf16>, vector<1x16x32xbf16>, vector<1x16x32xbf16> -> vector<4x16x32xbf16>
    %66 = vector.extract_strided_slice %47 {offsets = [0, 0], sizes = [16, 32], strides = [1, 1]} : vector<16x64xbf16> to vector<16x32xbf16>
    %67 = vector.extract_strided_slice %47 {offsets = [0, 0], sizes = [16, 32], strides = [1, 1]} : vector<16x64xbf16> to vector<16x32xbf16>
    %68 = vector.extract_strided_slice %47 {offsets = [0, 32], sizes = [16, 32], strides = [1, 1]} : vector<16x64xbf16> to vector<16x32xbf16>
    %69 = vector.extract_strided_slice %47 {offsets = [0, 32], sizes = [16, 32], strides = [1, 1]} : vector<16x64xbf16> to vector<16x32xbf16>
    %70 = vector.shape_cast %66 : vector<16x32xbf16> to vector<1x16x32xbf16>
    %71 = vector.shape_cast %67 : vector<16x32xbf16> to vector<1x16x32xbf16>
    %72 = vector.shape_cast %68 : vector<16x32xbf16> to vector<1x16x32xbf16>
    %73 = vector.shape_cast %69 : vector<16x32xbf16> to vector<1x16x32xbf16>
    %74 = tpu.concatenate %70, %71, %72, %73 in 0 : vector<1x16x32xbf16>, vector<1x16x32xbf16>, vector<1x16x32xbf16>, vector<1x16x32xbf16> -> vector<4x16x32xbf16>
    %75 = tpu.iota {dimensions = array<i32: 0>} : vector<16x16xi32>
    %76 = tpu.iota {dimensions = array<i32: 1>} : vector<16x16xi32>
    %77 = arith.cmpi sle, %76, %75 : vector<16x16xi32>
    %78 = vector.shape_cast %77 : vector<16x16xi1> to vector<1x16x16xi1>
    "tpu.trace_start"() <{level = 10 : i32, message = "hqd,hkd->hqk"}> : () -> ()
    %cst_21 = arith.constant dense<0.000000e+00> : vector<4x16x16xf32>
    %79 = tpu.matmul %56, %65, %cst_21 {dimension_numbers = #tpu.dot_dimension_numbers<[2], [2], [1], [1], [0, 0, 0, 1, 1, 1], [0], [0]>} : vector<4x16x32xbf16>, vector<4x16x32xbf16>, vector<4x16x16xf32> -> vector<4x16x16xf32>
    "tpu.trace_stop"() : () -> ()
    %cst_22 = arith.constant 0.176776692 : f32
    %80 = vector.broadcast %cst_22 : f32 to vector<4x16x16xf32>
    %81 = arith.mulf %79, %80 : vector<4x16x16xf32>
    %cst_23 = arith.constant -1.000000e+30 : f32
    %82 = vector.shape_cast %78 : vector<1x16x16xi1> to vector<1x16x16xi1>
    %83 = vector.broadcast %82 : vector<1x16x16xi1> to vector<4x16x16xi1>
    %84 = vector.broadcast %cst_23 : f32 to vector<4x16x16xf32>
    %85 = arith.select %83, %81, %84 : vector<4x16x16xi1>, vector<4x16x16xf32>
    %cst_24 = arith.constant dense<0xFF800000> : vector<4x16xf32>
    %86 = vector.multi_reduction <maximumf>, %85, %cst_24 [2] : vector<4x16x16xf32> to vector<4x16xf32>
    %87 = vector.shape_cast %86 : vector<4x16xf32> to vector<4x16x1xf32>
    %88 = vector.broadcast %87 : vector<4x16x1xf32> to vector<4x16x16xf32>
    %89 = arith.subf %85, %88 : vector<4x16x16xf32>
    %90 = math.exp %89 : vector<4x16x16xf32>
    %cst_25 = arith.constant dense<0.000000e+00> : vector<4x16xf32>
    %91 = vector.multi_reduction <add>, %90, %cst_25 [2] : vector<4x16x16xf32> to vector<4x16xf32>
    %92 = vector.shape_cast %91 : vector<4x16xf32> to vector<4x16x1xf32>
    %93 = vector.broadcast %92 : vector<4x16x1xf32> to vector<4x16x16xf32>
    %94 = arith.divf %90, %93 : vector<4x16x16xf32>
    %95 = arith.truncf %94 : vector<4x16x16xf32> to vector<4x16x16xbf16>
    "tpu.trace_start"() <{level = 10 : i32, message = "hqk,hkd->hqd"}> : () -> ()
    %cst_26 = arith.constant dense<0.000000e+00> : vector<4x16x32xf32>
    %96 = tpu.matmul %95, %74, %cst_26 {dimension_numbers = #tpu.dot_dimension_numbers<[2], [1], [1], [2], [0, 0, 0, 1, 1, 2], [0], [0]>} : vector<4x16x16xbf16>, vector<4x16x32xbf16>, vector<4x16x32xf32> -> vector<4x16x32xf32>
    "tpu.trace_stop"() : () -> ()
    %97 = vector.extract_strided_slice %96 {offsets = [0, 0, 0], sizes = [1, 16, 32], strides = [1, 1, 1]} : vector<4x16x32xf32> to vector<1x16x32xf32>
    %98 = vector.shape_cast %97 : vector<1x16x32xf32> to vector<16x32xf32>
    %99 = vector.extract_strided_slice %96 {offsets = [1, 0, 0], sizes = [1, 16, 32], strides = [1, 1, 1]} : vector<4x16x32xf32> to vector<1x16x32xf32>
    %100 = vector.shape_cast %99 : vector<1x16x32xf32> to vector<16x32xf32>
    %101 = vector.extract_strided_slice %96 {offsets = [2, 0, 0], sizes = [1, 16, 32], strides = [1, 1, 1]} : vector<4x16x32xf32> to vector<1x16x32xf32>
    %102 = vector.shape_cast %101 : vector<1x16x32xf32> to vector<16x32xf32>
    %103 = vector.extract_strided_slice %96 {offsets = [3, 0, 0], sizes = [1, 16, 32], strides = [1, 1, 1]} : vector<4x16x32xf32> to vector<1x16x32xf32>
    %104 = vector.shape_cast %103 : vector<1x16x32xf32> to vector<16x32xf32>
    %105 = tpu.concatenate %98, %100, %102, %104 in 1 : vector<16x32xf32>, vector<16x32xf32>, vector<16x32xf32>, vector<16x32xf32> -> vector<16x128xf32>
    %106 = arith.truncf %105 : vector<16x128xf32> to vector<16x128xbf16>
    %c0_27 = arith.constant 0 : index
    %c0_28 = arith.constant 0 : index
    %c0_29 = arith.constant 0 : index
    %107 = vector.load %arg5[%c0_27, %c0_28, %c0_29] : memref<1x128x128xbf16, #tpu.memory_space<vmem>>, vector<1x128x128xbf16>
    %108 = vector.shape_cast %107 : vector<1x128x128xbf16> to vector<128x128xbf16>
    %cst_30 = arith.constant dense<0.000000e+00> : vector<16x128xf32>
    %109 = tpu.matmul %106, %108, %cst_30 {dimension_numbers = #tpu.dot_dimension_numbers<[1], [0], [0], [1], [0, 0, 1, 1], [], []>} : vector<16x128xbf16>, vector<128x128xbf16>, vector<16x128xf32> -> vector<16x128xf32>
    %110 = arith.addf %3, %109 : vector<16x128xf32>
    %111 = vector.extract_strided_slice %5 {offsets = [1, 0], sizes = [1, 128], strides = [1, 1]} : vector<2x128xf32> to vector<1x128xf32>
    %112 = arith.mulf %110, %110 : vector<16x128xf32>
    %cst_31 = arith.constant dense<0.000000e+00> : vector<16xf32>
    %113 = vector.multi_reduction <add>, %112, %cst_31 [1] : vector<16x128xf32> to vector<16xf32>
    %114 = vector.shape_cast %113 : vector<16xf32> to vector<16x1xf32>
    %cst_32 = arith.constant 1.280000e+02 : f32
    %115 = vector.broadcast %cst_32 : f32 to vector<16x1xf32>
    %116 = arith.divf %114, %115 : vector<16x1xf32>
    %cst_33 = arith.constant 9.99999974E-6 : f32
    %117 = vector.broadcast %cst_33 : f32 to vector<16x1xf32>
    %118 = arith.addf %116, %117 : vector<16x1xf32>
    %119 = math.rsqrt %118 : vector<16x1xf32>
    %120 = vector.broadcast %119 : vector<16x1xf32> to vector<16x128xf32>
    %121 = arith.mulf %110, %120 : vector<16x128xf32>
    %122 = vector.broadcast %111 : vector<1x128xf32> to vector<16x128xf32>
    %123 = arith.mulf %121, %122 : vector<16x128xf32>
    %124 = arith.truncf %123 : vector<16x128xf32> to vector<16x128xbf16>
    %c0_34 = arith.constant 0 : index
    %c0_35 = arith.constant 0 : index
    %c0_36 = arith.constant 0 : index
    %125 = vector.load %arg6[%c0_34, %c0_35, %c0_36] : memref<1x128x512xbf16, #tpu.memory_space<vmem>>, vector<1x128x512xbf16>
    %126 = vector.shape_cast %125 : vector<1x128x512xbf16> to vector<128x512xbf16>
    %cst_37 = arith.constant dense<0.000000e+00> : vector<16x512xf32>
    %127 = tpu.matmul %124, %126, %cst_37 {dimension_numbers = #tpu.dot_dimension_numbers<[1], [0], [0], [1], [0, 0, 1, 1], [], []>} : vector<16x128xbf16>, vector<128x512xbf16>, vector<16x512xf32> -> vector<16x512xf32>
    %128 = vector.extract_strided_slice %127 {offsets = [0, 0], sizes = [16, 256], strides = [1, 1]} : vector<16x512xf32> to vector<16x256xf32>
    %129 = vector.extract_strided_slice %127 {offsets = [0, 256], sizes = [16, 256], strides = [1, 1]} : vector<16x512xf32> to vector<16x256xf32>
    %130 = arith.negf %128 : vector<16x256xf32>
    %131 = math.exp %130 : vector<16x256xf32>
    %cst_38 = arith.constant 1.000000e+00 : f32
    %132 = vector.broadcast %cst_38 : f32 to vector<16x256xf32>
    %133 = arith.addf %132, %131 : vector<16x256xf32>
    %134 = arith.divf %132, %133 : vector<16x256xf32>
    %135 = arith.mulf %128, %134 : vector<16x256xf32>
    %136 = arith.mulf %135, %129 : vector<16x256xf32>
    %137 = arith.truncf %136 : vector<16x256xf32> to vector<16x256xbf16>
    %c0_39 = arith.constant 0 : index
    %c0_40 = arith.constant 0 : index
    %c0_41 = arith.constant 0 : index
    %138 = vector.load %arg7[%c0_39, %c0_40, %c0_41] : memref<1x256x128xbf16, #tpu.memory_space<vmem>>, vector<1x256x128xbf16>
    %139 = vector.shape_cast %138 : vector<1x256x128xbf16> to vector<256x128xbf16>
    %cst_42 = arith.constant dense<0.000000e+00> : vector<16x128xf32>
    %140 = tpu.matmul %137, %139, %cst_42 {dimension_numbers = #tpu.dot_dimension_numbers<[1], [0], [0], [1], [0, 0, 1, 1], [], []>} : vector<16x256xbf16>, vector<256x128xbf16>, vector<16x128xf32> -> vector<16x128xf32>
    %141 = arith.addf %110, %140 : vector<16x128xf32>
    %c0_43 = arith.constant 0 : index
    %c0_44 = arith.constant 0 : index
    %142 = vector.load %arg11[%c0_43, %c0_44] : memref<16x128xf32, #tpu.memory_space<vmem>>, vector<16x128xf32>
    tpu.vector_store %arg11[%c0_43, %c0_44], %141 {strides = array<i32>} : memref<16x128xf32, #tpu.memory_space<vmem>>, vector<16x128xf32>,
    %143 = arith.truncf %141 : vector<16x128xf32> to vector<16x128xbf16>
    %c0_45 = arith.constant 0 : index
    %c0_46 = arith.constant 0 : index
    %144 = vector.load %arg10[%c0_45, %c0_46] : memref<16x128xbf16, #tpu.memory_space<vmem>>, vector<16x128xbf16>
    tpu.vector_store %arg10[%c0_45, %c0_46], %143 {strides = array<i32>} : memref<16x128xbf16, #tpu.memory_space<vmem>>, vector<16x128xbf16>,
    %c1_i32_47 = arith.constant 1 : i32
    %145 = arith.cmpi eq, %arg0, %c1_i32_47 : i32
    %146 = arith.extui %145 : i1 to i32
    %c0_i32_48 = arith.constant 0 : i32
    %147 = arith.cmpi ne, %146, %c0_i32_48 : i32
    scf.if %147 {
      %c0_49 = arith.constant 0 : index
      %c0_50 = arith.constant 0 : index
      %148 = vector.load %arg9[%c0_49, %c0_50] : memref<1x128xf32, #tpu.memory_space<vmem>>, vector<1x128xf32>
      %149 = arith.mulf %141, %141 : vector<16x128xf32>
      %cst_51 = arith.constant dense<0.000000e+00> : vector<16xf32>
      %150 = vector.multi_reduction <add>, %149, %cst_51 [1] : vector<16x128xf32> to vector<16xf32>
      %151 = vector.shape_cast %150 : vector<16xf32> to vector<16x1xf32>
      %cst_52 = arith.constant 1.280000e+02 : f32
      %152 = vector.broadcast %cst_52 : f32 to vector<16x1xf32>
      %153 = arith.divf %151, %152 : vector<16x1xf32>
      %cst_53 = arith.constant 9.99999974E-6 : f32
      %154 = vector.broadcast %cst_53 : f32 to vector<16x1xf32>
      %155 = arith.addf %153, %154 : vector<16x1xf32>
      %156 = math.rsqrt %155 : vector<16x1xf32>
      %157 = vector.broadcast %156 : vector<16x1xf32> to vector<16x128xf32>
      %158 = arith.mulf %141, %157 : vector<16x128xf32>
      %159 = vector.broadcast %148 : vector<1x128xf32> to vector<16x128xf32>
      %160 = arith.mulf %158, %159 : vector<16x128xf32>
      %161 = arith.truncf %160 : vector<16x128xf32> to vector<16x128xbf16>
      %c0_54 = arith.constant 0 : index
      %c0_55 = arith.constant 0 : index
      %162 = vector.load %arg10[%c0_54, %c0_55] : memref<16x128xbf16, #tpu.memory_space<vmem>>, vector<16x128xbf16>
      tpu.vector_store %arg10[%c0_54, %c0_55], %161 {strides = array<i32>} : memref<16x128xbf16, #tpu.memory_space<vmem>>, vector<16x128xbf16>,
    } else {
    }
    return
  }
  func.func @transform_0(%arg0: i32) -> (i32, i32) {
    %c0_i32 = arith.constant 0 : i32
    %c0_i32_0 = arith.constant 0 : i32
    %c0_i32_1 = arith.constant 0 : i32
    return %c0_i32, %c0_i32_0 : i32, i32
  }
  func.func @transform_1(%arg0: i32) -> (i32, i32, i32) {
    %c0_i32 = arith.constant 0 : i32
    %c0_i32_0 = arith.constant 0 : i32
    %c0_i32_1 = arith.constant 0 : i32
    return %arg0, %c0_i32, %c0_i32_0 : i32, i32, i32
  }
  func.func @transform_2(%arg0: i32) -> (i32, i32, i32) {
    %c0_i32 = arith.constant 0 : i32
    %c0_i32_0 = arith.constant 0 : i32
    %c0_i32_1 = arith.constant 0 : i32
    return %arg0, %c0_i32, %c0_i32_0 : i32, i32, i32
  }
  func.func @transform_3(%arg0: i32) -> (i32, i32, i32) {
    %c0_i32 = arith.constant 0 : i32
    %c0_i32_0 = arith.constant 0 : i32
    %c0_i32_1 = arith.constant 0 : i32
    return %arg0, %c0_i32, %c0_i32_0 : i32, i32, i32
  }
  func.func @transform_4(%arg0: i32) -> (i32, i32, i32) {
    %c0_i32 = arith.constant 0 : i32
    %c0_i32_0 = arith.constant 0 : i32
    %c0_i32_1 = arith.constant 0 : i32
    return %arg0, %c0_i32, %c0_i32_0 : i32, i32, i32
  }
  func.func @transform_5(%arg0: i32) -> (i32, i32, i32) {
    %c0_i32 = arith.constant 0 : i32
    %c0_i32_0 = arith.constant 0 : i32
    %c0_i32_1 = arith.constant 0 : i32
    return %arg0, %c0_i32, %c0_i32_0 : i32, i32, i32
  }
  func.func @transform_6(%arg0: i32) -> (i32, i32, i32) {
    %c0_i32 = arith.constant 0 : i32
    %c0_i32_0 = arith.constant 0 : i32
    %c0_i32_1 = arith.constant 0 : i32
    return %arg0, %c0_i32, %c0_i32_0 : i32, i32, i32
  }
  func.func @transform_7(%arg0: i32) -> (i32, i32, i32) {
    %c0_i32 = arith.constant 0 : i32
    %c0_i32_0 = arith.constant 0 : i32
    %c0_i32_1 = arith.constant 0 : i32
    %c0_i32_2 = arith.constant 0 : i32
    return %c0_i32, %c0_i32_0, %c0_i32_1 : i32, i32, i32
  }
  func.func @transform_8(%arg0: i32) -> (i32, i32) {
    %c0_i32 = arith.constant 0 : i32
    %c0_i32_0 = arith.constant 0 : i32
    %c0_i32_1 = arith.constant 0 : i32
    return %c0_i32, %c0_i32_0 : i32, i32
  }
  func.func @transform_9(%arg0: i32) -> (i32, i32) {
    %c0_i32 = arith.constant 0 : i32
    %c0_i32_0 = arith.constant 0 : i32
    %c0_i32_1 = arith.constant 0 : i32
    return %c0_i32, %c0_i32_0 : i32, i32
  }
}

</mosaic_0001>

<bundles_post_ra>
// kernel: tile.26
= control target key start
LH: loop header
LB: loop body
LE: loop exit
PB: predicated region body
PF: predicated region fallthrough
CT: control target
= control target key end

     0   :  { %s22_s0 = inlined_call_operand.vmem [shape: f32[2], index: 0, kind: input, shape index: {}]   ;;  %s23_s1 = inlined_call_operand.vmem [shape: f32[8,2], index: 1, kind: output, shape index: {}]  }
   0x1   :  { %v4_v0 = vld [vmem:[%s22_s0] ss:$0 sm:$0xff] }
   0x2   :  { %5 = vst [vmem:[%s23_s1] sm:$0xff] %v4_v0 }

// kernel: mul.21
= control target key start
LH: loop header
LB: loop body
LE: loop exit
PB: predicated region body
PF: predicated region fallthrough
CT: control target
= control target key end

     0   :  { %s67_s10 = smov 14   ;;  %s68_s11 = smov 10   ;;  %vm3_vm0 = vcmask 15360   ;;  %vm9_vm1 = vcmask 130160   ;;  %vm15_vm2 = vcmask 113760   ;;  %vm21_vm3 = vcmask 97360   ;;  %s111_s0 = inlined_call_operand.vmem [shape: f32[8,2], index: 0, kind: input, shape index: {}]   ;;  %s112_s1 = inlined_call_operand.vmem [shape: f32[16], index: 1, kind: output, shape index: {}]  }
   0x1   :  { %v53_v0 = vld [vmem:[%s111_s0 + $0x7] sm:$0x1]   ;;  %v55_v1 = vld [vmem:[%s111_s0 + $0x5] sm:$0x1]   ;;  %v54_v2 = vld [vmem:[%s111_s0 + $0x6] sm:$0x1]  }
   0x2   :  { %7 = vrot.lane.b32.xlu0 %v53_v0, %s67_s10  ;;  %19 = vrot.lane.b32.xlu1 %v55_v1, %s68_s11  ;;  %v56_v3 = vld [vmem:[%s111_s0 + $0x4] sm:$0x1]   ;;  %v2_v4 = vld [vmem:[%s111_s0] sm:$0x1]   ;;  %s69_s18 = smov 12   ;;  %s70_s19 = smov 8  }
   0x3   :  { %4 = vst.msk [vmem:[#allocation0] sm:$0x1] %vm3_vm0, %v2_v4   ;;  %v57_v5 = vld [vmem:[%s111_s0 + $0x3] sm:$0x1]   ;;  %v58_v6 = vld [vmem:[%s111_s0 + $0x2] sm:$0x1]  }
   0x4   :  { %s71_s24 = smov 6   ;;  %s72_s25 = smov 4   ;;  %v59_v7 = vld [vmem:[%s111_s0 + $0x1] sm:$0x1]   ;;  %vm27_vm4 = vcmask 80960   ;;  %vm33_vm5 = vcmask 64560  }
   0x5   :  { %s73_s0 = smov 2   ;;  %vm39_vm6 = vcmask 48160   ;;  %vm45_vm7 = vcmask 31760  }
   0x6   :  { %13 = vrot.lane.b32.xlu0 %v54_v2, %s69_s18  ;;  %25 = vrot.lane.b32.xlu1 %v56_v3, %s70_s19 }
   0xa   :  { %31 = vrot.lane.b32.xlu0 %v57_v5, %s71_s24  ;;  %37 = vrot.lane.b32.xlu1 %v58_v6, %s72_s25 }
   0xe   :  { %43 = vrot.lane.b32.xlu0 %v59_v7, %s73_s0 }
  0x74   :  { %v8_v8 = vpop.permute.xlu0 %7   ;;  %v20_v9 = vpop.permute.xlu1 %19  }
  0x75   :  { %10 = vst.msk [vmem:[#allocation0] sm:$0x1] %vm9_vm1, %v8_v8  }
  0x78   :  { %v14_v10 = vpop.permute.xlu0 %13   ;;  %v26_v11 = vpop.permute.xlu1 %25  }
  0x79   :  { %16 = vst.msk [vmem:[#allocation0] sm:$0x1] %vm15_vm2, %v14_v10  }
  0x7a   :  { %22 = vst.msk [vmem:[#allocation0] sm:$0x1] %vm21_vm3, %v20_v9  }
  0x7b   :  { %28 = vst.msk [vmem:[#allocation0] sm:$0x1] %vm27_vm4, %v26_v11  }
  0x7c   :  { %v32_v12 = vpop.permute.xlu0 %31   ;;  %v38_v13 = vpop.permute.xlu1 %37  }
  0x7d   :  { %34 = vst.msk [vmem:[#allocation0] sm:$0x1] %vm33_vm5, %v32_v12  }
  0x7e   :  { %40 = vst.msk [vmem:[#allocation0] sm:$0x1] %vm39_vm6, %v38_v13  }
  0x80   :  { %v44_v14 = vpop.permute.xlu0 %43  }
  0x81   :  { %46 = vst.msk [vmem:[#allocation0] sm:$0x1] %vm45_vm7, %v44_v14  }
  0x88   :  { %v50_v15 = vld [vmem:[#allocation0] sm:$0x1] }
  0x89   :  { %52 = vst [vmem:[%s112_s1] sm:$0x1] %v50_v15 }

// kernel: tile.47
= control target key start
LH: loop header
LB: loop body
LE: loop exit
PB: predicated region body
PF: predicated region fallthrough
CT: control target
= control target key end

     0   :  { %vm82_vm0 = vcmask 1047556   ;;  %vm84_vm1 = vcmask 261120   ;;  %vm103_vm2 = vcmask 523520   ;;  %s225_s0 = inlined_call_operand.vmem [shape: f32[16,2,32], index: 0, kind: input, shape index: {}]   ;;  %s226_s1 = inlined_call_operand.vmem [shape: f32[16,64], index: 1, kind: output, shape index: {}]  }
   0x1   :  { %v138_v0 = vld [vmem:[%s225_s0 + $0xe] sm:$0x3]  ;;  %v139_v1 = vld [vmem:[%s225_s0 + $0xc] sm:$0x3]  ;;  %v140_v2 = vld [vmem:[%s225_s0 + $0xa] sm:$0x3] }
   0x2   :  { %48 = vst [vmem:[#allocation0 + $0x38] sm:$0x3] %v138_v0  ;;  %53 = vst [vmem:[#allocation0 + $0x30] sm:$0x3] %v139_v1  ;;  %v141_v3 = vld [vmem:[%s225_s0 + $0x8] sm:$0x3] }
   0x3   :  { %58 = vst [vmem:[#allocation0 + $0x28] sm:$0x3] %v140_v2  ;;  %v142_v4 = vld [vmem:[%s225_s0 + $0x6] sm:$0x3]  ;;  %v143_v5 = vld [vmem:[%s225_s0 + $0x4] sm:$0x3] }
   0x4   :  { %63 = vst [vmem:[#allocation0 + $0x20] sm:$0x3] %v141_v3  ;;  %68 = vst [vmem:[#allocation0 + $0x18] sm:$0x3] %v142_v4  ;;  %v144_v6 = vld [vmem:[%s225_s0 + $0x2] sm:$0x3] }
   0x5   :  { %73 = vst [vmem:[#allocation0 + $0x10] sm:$0x3] %v143_v5  ;;  %v78_v7 = vld [vmem:[%s225_s0] sm:$0x3]  ;;  %77 = vst [vmem:[#allocation0 + $0x8] sm:$0x3] %v144_v6 }
   0x6   :  { %79 = vst [vmem:[#allocation0] sm:$0x3] %v78_v7  ;;  %v130_v8 = vld [vmem:[%s225_s0 + $0x1e] sm:$0x3]  ;;  %v131_v9 = vld [vmem:[%s225_s0 + $0x1c] sm:$0x3] }
   0x7   :  { %v132_v10 = vld [vmem:[%s225_s0 + $0x1a] sm:$0x3]  ;;  %8 = vst [vmem:[#allocation0 + $0x78] sm:$0x3] %v130_v8  ;;  %13 = vst [vmem:[#allocation0 + $0x70] sm:$0x3] %v131_v9 }
   0x8   :  { %18 = vst [vmem:[#allocation0 + $0x68] sm:$0x3] %v132_v10  ;;  %v133_v11 = vld [vmem:[%s225_s0 + $0x18] sm:$0x3]  ;;  %v134_v12 = vld [vmem:[%s225_s0 + $0x16] sm:$0x3] }
   0x9   :  { %v135_v13 = vld [vmem:[%s225_s0 + $0x14] sm:$0x3]  ;;  %23 = vst [vmem:[#allocation0 + $0x60] sm:$0x3] %v133_v11  ;;  %28 = vst [vmem:[#allocation0 + $0x58] sm:$0x3] %v134_v12 }
   0xa   :  { %33 = vst [vmem:[#allocation0 + $0x50] sm:$0x3] %v135_v13  ;;  %v136_v14 = vld [vmem:[%s225_s0 + $0x12] sm:$0x3]  ;;  %v137_v15 = vld [vmem:[%s225_s0 + $0x10] sm:$0x3] }
   0xb   :  { %38 = vst [vmem:[#allocation0 + $0x48] sm:$0x3] %v136_v14  ;;  %43 = vst [vmem:[#allocation0 + $0x40] sm:$0x3] %v137_v15  ;;  %s148_s0 = smov 32  }
   0xc   :  { %v98_v16 = vld [vmem:[#allocation0 + $0x1] ss:$8 sm:$0xf0]   ;;  %v81_v17 = vld [vmem:[#allocation0] ss:$8 sm:$0xf0]  }
   0xd   :  { %v96_v18 = vld [vmem:[#allocation0 + $0x1] ss:$8 sm:$0xf]   ;;  %v80_v19 = vld [vmem:[#allocation0] ss:$8 sm:$0xf]  }
   0xe   :  { %v100_v20 = vsel %vm82_vm0, %v98_v16, %v96_v18  ;;  %v83_v21 = vsel %vm82_vm0, %v81_v17, %v80_v19 }
   0xf   :  { %101 = vrot.lane.b32.xlu0 %v100_v20, %s148_s0  ;;  %85 = vst.msk [vmem:[%s226_s1] sm:$0xff] %vm84_vm1, %v83_v21  }
  0x10   :  { %v108_v22 = vld [vmem:[#allocation0 + $0x41] ss:$8 sm:$0xf0]   ;;  %v89_v23 = vld [vmem:[#allocation0 + $0x40] ss:$8 sm:$0xf0]  }
  0x12   :  { %v106_v24 = vld [vmem:[#allocation0 + $0x41] ss:$8 sm:$0xf]   ;;  %v87_v25 = vld [vmem:[#allocation0 + $0x40] ss:$8 sm:$0xf]  }
  0x13   :  { %v110_v26 = vsel %vm82_vm0, %v108_v22, %v106_v24  ;;  %v91_v27 = vsel %vm82_vm0, %v89_v23, %v87_v25 }
  0x14   :  { %145 = vst.msk [vmem:[%s226_s1 + $0x8] sm:$0xff] %vm84_vm1, %v91_v27   ;;  %111 = vrot.lane.b32.xlu0 %v110_v26, %s148_s0 }
  0x81   :  { %v102_v28 = vpop.permute.xlu0 %101  }
  0x82   :  { %104 = vst.msk [vmem:[%s226_s1] sm:$0xff] %vm103_vm2, %v102_v28  }
  0x86   :  { %v112_v29 = vpop.permute.xlu0 %111  }
  0x87   :  { %146 = vst.msk [vmem:[%s226_s1 + $0x8] sm:$0xff] %vm103_vm2, %v112_v29  }

// kernel: tile.42
= control target key start
LH: loop header
LB: loop body
LE: loop exit
PB: predicated region body
PF: predicated region fallthrough
CT: control target
= control target key end

     0   :  { %vm82_vm0 = vcmask 1047556   ;;  %vm84_vm1 = vcmask 261120   ;;  %s195_s9 = smov 96   ;;  %s196_s14 = smov 32   ;;  %vm103_vm2 = vcmask 1048320   ;;  %vm124_vm3 = vcmask 785920   ;;  %s289_s0 = inlined_call_operand.vmem [shape: f32[16,4,32], index: 0, kind: input, shape index: {}]   ;;  %s290_s1 = inlined_call_operand.vmem [shape: f32[16,128], index: 1, kind: output, shape index: {}]  }
   0x1   :  { %v180_v0 = vld [vmem:[%s289_s0 + $0x1c] sm:$0xf]  ;;  %v181_v1 = vld [vmem:[%s289_s0 + $0x18] sm:$0xf]  ;;  %v182_v2 = vld [vmem:[%s289_s0 + $0x14] sm:$0xf] }
   0x2   :  { %48 = vst [vmem:[#allocation0 + $0x38] sm:$0xf] %v180_v0  ;;  %53 = vst [vmem:[#allocation0 + $0x30] sm:$0xf] %v181_v1  ;;  %v183_v3 = vld [vmem:[%s289_s0 + $0x10] sm:$0xf] }
   0x3   :  { %58 = vst [vmem:[#allocation0 + $0x28] sm:$0xf] %v182_v2  ;;  %v184_v4 = vld [vmem:[%s289_s0 + $0xc] sm:$0xf]  ;;  %v185_v5 = vld [vmem:[%s289_s0 + $0x8] sm:$0xf] }
   0x4   :  { %63 = vst [vmem:[#allocation0 + $0x20] sm:$0xf] %v183_v3  ;;  %68 = vst [vmem:[#allocation0 + $0x18] sm:$0xf] %v184_v4  ;;  %v186_v6 = vld [vmem:[%s289_s0 + $0x4] sm:$0xf] }
   0x5   :  { %73 = vst [vmem:[#allocation0 + $0x10] sm:$0xf] %v185_v5  ;;  %v78_v7 = vld [vmem:[%s289_s0] sm:$0xf]  ;;  %77 = vst [vmem:[#allocation0 + $0x8] sm:$0xf] %v186_v6 }
   0x6   :  { %79 = vst [vmem:[#allocation0] sm:$0xf] %v78_v7  ;;  %v172_v8 = vld [vmem:[%s289_s0 + $0x3c] sm:$0xf]  ;;  %v173_v9 = vld [vmem:[%s289_s0 + $0x38] sm:$0xf] }
   0x7   :  { %8 = vst [vmem:[#allocation0 + $0x78] sm:$0xf] %v172_v8  ;;  %13 = vst [vmem:[#allocation0 + $0x70] sm:$0xf] %v173_v9  ;;  %v174_v10 = vld [vmem:[%s289_s0 + $0x34] sm:$0xf] }
   0x8   :  { %v175_v11 = vld [vmem:[%s289_s0 + $0x30] sm:$0xf]  ;;  %v176_v12 = vld [vmem:[%s289_s0 + $0x2c] sm:$0xf]  ;;  %18 = vst [vmem:[#allocation0 + $0x68] sm:$0xf] %v174_v10 }
   0x9   :  { %23 = vst [vmem:[#allocation0 + $0x60] sm:$0xf] %v175_v11  ;;  %28 = vst [vmem:[#allocation0 + $0x58] sm:$0xf] %v176_v12  ;;  %v177_v13 = vld [vmem:[%s289_s0 + $0x28] sm:$0xf] }
   0xa   :  { %v178_v14 = vld [vmem:[%s289_s0 + $0x24] sm:$0xf]  ;;  %v179_v15 = vld [vmem:[%s289_s0 + $0x20] sm:$0xf]  ;;  %33 = vst [vmem:[#allocation0 + $0x50] sm:$0xf] %v177_v13 }
   0xb   :  { %38 = vst [vmem:[#allocation0 + $0x48] sm:$0xf] %v178_v14  ;;  %43 = vst [vmem:[#allocation0 + $0x40] sm:$0xf] %v179_v15  ;;  %s194_s0 = smov 64   ;;  %vm145_vm4 = vcmask 523520  }
   0xc   :  { %v119_v16 = vld [vmem:[#allocation0 + $0x2] ss:$8 sm:$0xf0]   ;;  %v98_v17 = vld [vmem:[#allocation0 + $0x3] ss:$8 sm:$0xf0]  }
   0xd   :  { %v117_v18 = vld [vmem:[#allocation0 + $0x2] ss:$8 sm:$0xf]   ;;  %v96_v19 = vld [vmem:[#allocation0 + $0x3] ss:$8 sm:$0xf]  }
   0xe   :  { %v121_v20 = vsel %vm82_vm0, %v119_v16, %v117_v18  ;;  %v100_v21 = vsel %vm82_vm0, %v98_v17, %v96_v19  ;;  %v138_v24 = vld [vmem:[#allocation0 + $0x1] ss:$8 sm:$0xf]   ;;  %v80_v32 = vld [vmem:[#allocation0] ss:$8 sm:$0xf]  }
   0xf   :  { %122 = vrot.lane.b32.xlu1 %v121_v20, %s194_s0  ;;  %101 = vrot.lane.b32.xlu0 %v100_v21, %s195_s9  ;;  %v140_v25 = vld [vmem:[#allocation0 + $0x1] ss:$8 sm:$0xf0]   ;;  %v81_v33 = vld [vmem:[#allocation0] ss:$8 sm:$0xf0]  }
  0x10   :  { %v129_v22 = vld [vmem:[#allocation0 + $0x42] ss:$8 sm:$0xf0]   ;;  %v108_v23 = vld [vmem:[#allocation0 + $0x43] ss:$8 sm:$0xf0]   ;;  %v83_v34 = vsel %vm82_vm0, %v81_v33, %v80_v32  ;;  %v142_v38 = vsel %vm82_vm0, %v140_v25, %v138_v24 }
  0x11   :  { %v150_v31 = vld [vmem:[#allocation0 + $0x41] ss:$8 sm:$0xf0]   ;;  %v89_v36 = vld [vmem:[#allocation0 + $0x40] ss:$8 sm:$0xf0]  }
  0x12   :  { %v127_v26 = vld [vmem:[#allocation0 + $0x42] ss:$8 sm:$0xf]   ;;  %v106_v27 = vld [vmem:[#allocation0 + $0x43] ss:$8 sm:$0xf]  }
  0x13   :  { %v131_v28 = vsel %vm82_vm0, %v129_v22, %v127_v26  ;;  %v110_v29 = vsel %vm82_vm0, %v108_v23, %v106_v27  ;;  %v148_v30 = vld [vmem:[#allocation0 + $0x41] ss:$8 sm:$0xf]   ;;  %v87_v35 = vld [vmem:[#allocation0 + $0x40] ss:$8 sm:$0xf]  }
  0x14   :  { %132 = vrot.lane.b32.xlu1 %v131_v28, %s194_s0  ;;  %111 = vrot.lane.b32.xlu0 %v110_v29, %s195_s9  ;;  %v152_v37 = vsel %vm82_vm0, %v150_v31, %v148_v30  ;;  %85 = vst.msk [vmem:[%s290_s1] sm:$0xff] %vm84_vm1, %v83_v34   ;;  %v91_v39 = vsel %vm82_vm0, %v89_v36, %v87_v35 }
  0x15   :  { %187 = vst.msk [vmem:[%s290_s1 + $0x8] sm:$0xff] %vm84_vm1, %v91_v39  }
  0x18   :  { %153 = vrot.lane.b32.xlu1 %v152_v37, %s196_s14  ;;  %143 = vrot.lane.b32.xlu0 %v142_v38, %s196_s14 }
  0x81   :  { %v123_v40 = vpop.permute.xlu1 %122   ;;  %v102_v41 = vpop.permute.xlu0 %101  }
  0x82   :  { %104 = vst.msk [vmem:[%s290_s1] sm:$0xff] %vm103_vm2, %v102_v41  }
  0x83   :  { %125 = vst.msk [vmem:[%s290_s1] sm:$0xff] %vm124_vm3, %v123_v40  }
  0x86   :  { %v133_v42 = vpop.permute.xlu1 %132   ;;  %v112_v43 = vpop.permute.xlu0 %111  }
  0x87   :  { %188 = vst.msk [vmem:[%s290_s1 + $0x8] sm:$0xff] %vm103_vm2, %v112_v43  }
  0x88   :  { %189 = vst.msk [vmem:[%s290_s1 + $0x8] sm:$0xff] %vm124_vm3, %v133_v42  }
  0x8a   :  { %v154_v44 = vpop.permute.xlu1 %153   ;;  %v144_v45 = vpop.permute.xlu0 %143  }
  0x8b   :  { %190 = vst.msk [vmem:[%s290_s1 + $0x8] sm:$0xff] %vm145_vm4, %v154_v44   ;;  %146 = vst.msk [vmem:[%s290_s1] sm:$0xff] %vm145_vm4, %v144_v45  }

// kernel: chatglm_forward.1
= control target key start
LH: loop header
LB: loop body
LE: loop exit
PB: predicated region body
PF: predicated region fallthrough
CT: control target
= control target key end

     0   :  { %s3174_s0 = inlined_call_operand.hbm [shape: bf16[16,128], index: 0, kind: input, shape index: {}, may-alias: {0,9}]   ;;  %s3175_s1 = inlined_call_operand.vmem [shape: f32[2,2,128], index: 1, kind: input, shape index: {}]   ;;  %s3176_s2 = inlined_call_operand.vmem [shape: bf16[2,128,256], index: 2, kind: input, shape index: {}]   ;;  %s3177_s3 = inlined_call_operand.hbm [shape: f32[2,1,256], index: 3, kind: input, shape index: {}]   ;;  %s3178_s4 = inlined_call_operand.vmem [shape: bf16[2,128,128], index: 4, kind: input, shape index: {}]   ;;  %s3179_s5 = inlined_call_operand.vmem [shape: bf16[2,128,512], index: 5, kind: input, shape index: {}]   ;;  %s3180_s6 = inlined_call_operand.vmem [shape: bf16[2,256,128], index: 6, kind: input, shape index: {}]   ;;  %s3181_s7 = inlined_call_operand.vmem [shape: f32[2,16,256], index: 7, kind: input, shape index: {}]   ;;  %s3182_s8 = inlined_call_operand.vmem [shape: f32[1,128], index: 8, kind: input, shape index: {}]   ;;  %s3183_s9 = inlined_call_operand.hbm [shape: bf16[16,128], index: 9, kind: output, shape index: {}, may-alias: {0,9}]  }
   0x1   :  { %3189 = sst [smem:[#allocation13_spill]] %s3174_s0 }
   0x2   :  { %14 = vsyncpa [#allocation4], 0 }
   0x3   :  { %15 = vsyncpa [#allocation7], 0 }
   0x4   :  { %17 = vsyncpa [#allocation7 + $0x1], 0 }
   0x5   :  { %18 = vsyncpa [#allocation5], 0  ;;  %s2702_s30 = smov 0   ;;  %s2704_s10 = smov 0  }
   0x6   :  { %s2706_s11 = smov 0   ;;  %s2708_s12 = smov 0  }
   0x7 LB: > { %s2721_s13 = sadd.s32 4294967295, %s2636_s12   ;;  %p117_p0 = scmp.ne.s32.totalorder %s2628_s10, %s2624_s30  ;;  %s2636_s12 = sphi %s2708_s12, %s3206_s12   ;;  %s2632_s11 = sphi %s2706_s11, %s3209_s11   ;;  %s2628_s10 = sphi %s2704_s10, %s3208_s10   ;;  %s2624_s30 = sphi %s2702_s30, %s3207_s30  }
   0x8   : > { %p3184_p1 = scmp.eq.s32.totalorder %s2721_s13, 0  ;;  %p2014_p2 = scmp.ge.s32.totalorder %s2636_s12, 1 }
   0x9   : > { %p269_p3 = scmp.lt.s32.totalorder %s2636_s12, 3  ;;  %s2638_s16 = smov [#allocation3]  }
   0xa   : > { %p2730_p5 = por %p3184_p1, %p117_p0  ;;  %s281_s17 = sshll.u32 %s2638_s16, 4  ;;  %s282_s17 = int_to_ptr.vmem [resolvable:$true] %s281_s17 }
   0xb   : > { %p2734_p6 = pnand %p2014_p2, %p269_p3  ;;  %s2747_s19 = sadd.s32 1, %s2636_s12  }
   0xc   : > { %s3190_s14 = scalar_select %p2730_p5, 1, 0 }
   0xd   : > { %s3191_s15 = scalar_select %p2734_p6, 1, 0 }
   0xe   : > { %p2279_p7 = pneg %p2734_p6  ;;  %3193 = sst [smem:[#allocation12_spill]] %s2747_s19 }
   0xf   : > { %s104_s20 = sadd.s32 1, %s2632_s11  ;;  %s101_s21 = ssub.s32 %s2636_s12, %s2747_s19 }
  0x10   : > { %p2742_p8 = pnand %p2279_p7, %p3184_p1  ;;  %s3194_s0 = sld [smem:[#allocation13_spill]] }
  0x12   : > { %p2512_p10 = pneg %p2742_p8 }
  0x16   : > { %s2510_s24 = scalar_lea.hbm %s3194_s0, 128 }
  0x17   : > { %p2511_p9 = scmp.ne.s32.totalorder %s3194_s0, %s2510_s24  ;;  %p2517_p13 = scmp.lt.u32.totalorder %s2510_s24, %s3194_s0 }
  0x19   : > { %p2513_p11 = pnand %p2512_p10, %p2511_p9 }
  0x1b   : > { %p2514_p12 = pneg %p2513_p11 }
  0x1d   : > { %p2519_p0 = pnand %p2517_p13, %p2514_p12 }
  0x1f   : > { %2522 = shalt.err (!%p2519_p0)
}
  0x20   : > { %s2523_s29 = scalar_lea.vmem %s282_s17, 128  ;;  %p2531_p4 = scmp.lt.s32.totalorder %s282_s17, %s282_s17 }
  0x21   : > { %p2524_p2 = scmp.ne.s32.totalorder %s282_s17, %s2523_s29  ;;  %p2532_p1 = scmp.lt.s32.totalorder %s2523_s29, %s2523_s29 }
  0x23   : > { %p2526_p3 = pnand %p2524_p2, %p2512_p10  ;;  %p2533_p5 = por %p2532_p1, %p2531_p4 }
  0x25   : > { %p2527_p7 = pneg %p2526_p3 }
  0x27   : > { %p2534_p6 = pnand %p2533_p5, %p2527_p7 }
  0x29   : > { %2537 = shalt.err (!%p2534_p6)
}
  0x2a   : > { %s2639_s30 = smov 64   ;;  %s2640_s16 = smov 4  }
  0x2b   : > { %2282 = dma.hbm_to_vmem [thread:$0]  (!%p2742_p8), %s3194_s0, 128, %s282_s17, [#allocation4], %s2639_s30, %s2639_s30, %s2640_s16  }
  0x2c   : > { %p102_p9 = scmp.eq.s32.totalorder %s101_s21, 0  ;;  %p111_p10 = scmp.ne.s32.totalorder %s2632_s11, %s2628_s10 }
  0x2d   : > { %p112_p1 = scmp.eq.s32.totalorder %s2636_s12, 0  ;;  %p2288_p4 = scmp.lt.s32.totalorder %s2636_s12, 2 }
  0x2e   : > { %s2773_s24 = scalar_select %p102_p9, %s2632_s11, %s104_s20  }
  0x2f   : > { %p113_p5 = por %p112_p1, %p111_p10  ;;  %s316_s25 = sand.u32 1, %s2632_s11  }
  0x30   : > { %s2017_s26 = sshll.u32 %s316_s25, 1  ;;  %s2131_s27 = sshll.u32 %s2636_s12, 5 }
  0x31   : > { %s2780_s19 = scalar_lea.hbm %s3177_s3, %s2131_s27  ;;  %s320_s17 = scalar_lea.vmem [#allocation6], %s2017_s26 }
  0x32   : > { %s328_s18 = sshll.u32 %s320_s17, 4  ;;  %p2784_p6 = pnand %p2288_p4, %p113_p5  ;;  %s2782_s18 = int_to_ptr.vmem [resolvable:$true] %s328_s18 }
  0x33   : > { %s317_s12 = scalar_lea.sflag [#allocation7], %s316_s25  ;;  %s2538_s21 = scalar_lea.hbm %s2780_s19, 32 }
  0x34   : > { %p2539_p8 = scmp.ne.s32.totalorder %s2780_s19, %s2538_s21  ;;  %p2540_p11 = pneg %p2784_p6 }
  0x35   : > { %s2543_s22 = scalar_lea.hbm %s3177_s3, 64  ;;  %p2544_p0 = scmp.lt.u32.totalorder %s2780_s19, %s3177_s3 }
  0x36   : > { %p2541_p12 = pnand %p2540_p11, %p2539_p8  ;;  %p2545_p2 = scmp.lt.u32.totalorder %s2543_s22, %s2538_s21 }
  0x37   : > { %p2547_p7 = scmp.lt.u32.totalorder %s2538_s21, %s2780_s19 }
  0x38   : > { %p2542_p13 = pneg %p2541_p12  ;;  %p2546_p3 = por %p2545_p2, %p2544_p0 }
  0x3a   : > { %p2548_p9 = por %p2547_p7, %p2546_p3 }
  0x3c   : > { %p2549_p10 = pnand %p2548_p9, %p2542_p13 }
  0x3e   : > { %2552 = shalt.err (!%p2549_p10)
}
  0x3f   : > { %s2553_s25 = scalar_lea.vmem %s2782_s18, 32  ;;  %s2641_s27 = smov [#allocation6]  }
  0x40   : > { %p2554_p1 = scmp.ne.s32.totalorder %s2782_s18, %s2553_s25  ;;  %s2558_s28 = sshll.u32 %s2641_s27, 4  ;;  %s2559_s28 = int_to_ptr.vmem [resolvable:$false] %s2558_s28 }
  0x41   : > { %s2560_s29 = scalar_lea.vmem %s2559_s28, 64  ;;  %p2561_p8 = scmp.lt.s32.totalorder %s2782_s18, %s2559_s28 }
  0x42   : > { %p2556_p4 = pnand %p2554_p1, %p2540_p11  ;;  %p2562_p12 = scmp.lt.s32.totalorder %s2560_s29, %s2553_s25 }
  0x44   : > { %p2557_p5 = pneg %p2556_p4  ;;  %p2563_p0 = por %p2562_p12, %p2561_p8 }
  0x46   : > { %p2564_p2 = pnand %p2563_p0, %p2557_p5 }
  0x48   : > { %2567 = shalt.err (!%p2564_p2)
}
  0x49   : > { %2286 = dma.hbm_to_vmem [thread:$0]  (!%p2784_p6), %s2780_s19, 32, %s2782_s18, %s317_s12  }
  0x4a   : > { %p3196_p13 = scmp.ne.s32.totalorder %s3191_s15, 0 }
  0x4b   : > { %p3197_p11 = scmp.eq.s32.totalorder (!%p3196_p13), %s2721_s13, 0 }
  0x4c   : > { %361 = sbr.rel (%p3196_p13) target bundleno = 2672 (0xa70), region = 56 }
  0x53   : > { %2611 = dma.done.wait (%p3197_p11), [#allocation4], 128   ;;  %p3198_p3 = pmov %p3197_p11 }
  0x54   : > { %s367_s17 = sand.u32 1, %s2628_s10   ;;  %p3199_p7 = scmp.ne.s32.totalorder %s3190_s14, 0 }
  0x55   : > { %2613 = vsyncadd (%p3198_p3), [#allocation4], 4294967168  ;;  %s2820_s21 = sshll.u32 %s367_s17, 1  ;;  %s368_s30 = scalar_lea.sflag [#allocation7], %s367_s17 }
  0x56   : > { %2615 = dma.done.wait (%p3199_p7), %s368_s30, 32  }
  0x57   : > { %2617 = vsyncadd (%p3199_p7), %s368_s30, 4294967264  ;;  %p425_p6 = scmp.lt.s32.totalorder %s2721_s13, 1  ;;  %p3200_p9 = scmp.ne.s32.totalorder %s2721_s13, 0 }
  0x58   : > { %v2141_v0 = vld [vmem:[#allocation3] sm:$0xff] (!%p3200_p9)  }
  0x59   : > { %s426_s15 = scalar_select %p425_p6, %s2721_s13, 1 }
  0x5a   : > { %453 = sbr.rel (%p3200_p9) target bundleno = 97 (0x61), region = 68  ;;  %v2142_v1 = vunpack.c.l.bf16 (!%p3200_p9), %v2141_v0  ;;  %v2143_v2 = vunpack.c.h.bf16 (!%p3200_p9), %v2141_v0 }
  0x5b   : > { %s2023_s19 = sshll.u32 %s426_s15, 1  ;;  %s2132_s18 = sshll.u32 %s426_s15, 7 }
  0x5c   : > { %s2832_s22 = scalar_lea.vmem %s3175_s1, %s2023_s19  ;;  %s2837_s25 = scalar_lea.vmem %s3176_s2, %s2132_s18  ;;  %458 = vst [vmem:[#allocation2] sm:$0xff] (!%p3200_p9), %v2142_v1  ;;  %459 = vst [vmem:[#allocation2 + $0x8] sm:$0xff] (!%p3200_p9), %v2143_v2 }
  0x5d   : > { %s2133_s27 = sshll.u32 %s426_s15, 6  ;;  %s2134_s28 = sshll.u32 %s426_s15, 8 }
  0x5e   : > { %s2842_s17 = scalar_lea.vmem %s3178_s4, %s2133_s27  ;;  %s2847_s0 = scalar_lea.vmem %s3179_s5, %s2134_s28 }
  0x5f   : > { %s2852_s16 = scalar_lea.vmem %s3180_s6, %s2132_s18 }
  0x61 PF: > { %v2352_v6 = vld [vmem:[%s2837_s25 + $0x4] ss:$8 sps:$4 sm:$0xff]   ;;  %v2354_v7 = vld [vmem:[%s2837_s25] ss:$8 sps:$4 sm:$0xff]   ;;  %v2355_v8 = vld [vmem:[%s2837_s25 + $0x14] ss:$8 sps:$4 sm:$0xff]   ;;  %v478_v29 = vlaneseq }
  0x62   : > { %593 = vmatprep.subr.bf16.mxu0 %v2352_v6  ;;  %v2357_v10 = vld [vmem:[%s2837_s25 + $0x10] ss:$8 sps:$4 sm:$0xff]   ;;  %v2358_v11 = vld [vmem:[%s2837_s25 + $0x24] ss:$8 sps:$4 sm:$0xff]   ;;  %v2360_v12 = vld [vmem:[%s2837_s25 + $0x20] ss:$8 sps:$4 sm:$0xff]  }
  0x63   : > { %v460_v3 = vld [vmem:[#allocation2] sm:$0xff]  ;;  %v461_v4 = vld [vmem:[#allocation2 + $0x8] sm:$0xff]  ;;  %594 = vmatpush1.bf16.msra.mxu0 %v2354_v7  ;;  %v2361_v13 = vld [vmem:[%s2837_s25 + $0x34] ss:$8 sps:$4 sm:$0xff]   ;;  %v2642_v20 = vmov 0   ;;  %v2873_v31 = vshrl.u32 %v478_v29, 7 }
  0x64   : > { %v463_v5 = vmul.f32 %v460_v3, %v460_v3  ;;  %v464_v9 = vmul.f32 %v461_v4, %v461_v4  ;;  %595 = vmatprep.subr.bf16.mxu0 %v2355_v8  ;;  %v2363_v14 = vld [vmem:[%s2837_s25 + $0x30] ss:$8 sps:$4 sm:$0xff]   ;;  %v2364_v15 = vld [vmem:[%s2837_s25 + $0x44] ss:$8 sps:$4 sm:$0xff]   ;;  %v2366_v16 = vld [vmem:[%s2837_s25 + $0x40] ss:$8 sps:$4 sm:$0xff]   ;;  %625 = vmatprep.mubr.bf16.mxu0 %v2642_v20 }
  0x65   : > { %v2367_v17 = vld [vmem:[%s2837_s25 + $0x54] ss:$8 sps:$4 sm:$0xff]   ;;  %v2369_v18 = vld [vmem:[%s2837_s25 + $0x50] ss:$8 sps:$4 sm:$0xff]   ;;  %v2370_v19 = vld [vmem:[%s2837_s25 + $0x64] ss:$8 sps:$4 sm:$0xff]  }
  0x66   : > { %465 = vadd.xlane.f32.xlu0 %v463_v5  ;;  %v2372_v21 = vld [vmem:[%s2837_s25 + $0x60] ss:$8 sps:$4 sm:$0xff]   ;;  %v2373_v22 = vld [vmem:[%s2837_s25 + $0x74] ss:$8 sps:$4 sm:$0xff]   ;;  %v2375_v23 = vld [vmem:[%s2837_s25 + $0x70] ss:$8 sps:$4 sm:$0xff]  }
  0x67   : > { %596 = vmatpush1.bf16.msra.mxu0 %v2357_v10  ;;  %v480_v32 = vsub.s32 0, %v2873_v31  ;;  %v2877_v34 = vld [vmem:[%s2832_s22] sm:$0x3]  ;;  %s3201_s20 = scalar_lea.vmem [#allocation6], %s2820_s21  ;;  %v509_v43 = vsub.s32 1, %v2873_v31  ;;  %s2643_s15 = smov 1  }
  0x68   : > { %597 = vmatprep.subr.bf16.mxu0 %v2358_v11  ;;  %v501_v42 = vld [vmem:[%s3201_s20] sm:$0x3]  ;;  %s2644_s18 = smov 127   ;;  %v2645_v53 = vmov 0.0   ;;  %vm2646_vm0 = vmmov 0   ;;  %v2891_v57 = vand.u32 127, %v478_v29 }
  0x69   : > { %v481_v36 = vrot.slane %v2877_v34, %v480_v32  ;;  %v506_v44 = vrot.slane %v501_v42, %v480_v32  ;;  %v510_v45 = vrot.slane %v501_v42, %v509_v43  ;;  %2201 = vmatprep.subr.bf16.mxu1 %v2645_v53  ;;  %2203 = vmatprep.mubr.msk.bf16.mxu1 %vm2646_vm0, %v2645_v53  ;;  %v2049_v8 = vld [vmem:[%s3181_s7 + $0x20] sm:$0xff]  ;;  %vm711_vm5 = vcmask 261120   ;;  %s2647_s22 = smov 96   ;;  %s2648_s23 = smov 32  }
  0x6a   : > { %467 = vadd.xlane.f32.xlu0 %v464_v9  ;;  %v673_v59 = vadd.s32 128, %v2891_v57  ;;  %v674_v61 = vand.u32 1, %v2891_v57  ;;  %vm668_vm1 = vcmp.lt.s32.totalorder %v2891_v57, 127  ;;  %vm655_vm2 = vcmp.lt.s32.totalorder %v2891_v57, 1  ;;  %v2050_v9 = vld [vmem:[%s3181_s7 + $0x28] sm:$0xff]  ;;  %s2649_s26 = smov 64  }
  0x6b   : > { %598 = vmatpush1.bf16.msra.mxu0 %v2360_v12  ;;  %v636_v12 = vld [vmem:[%s3181_s7] sm:$0xff]  ;;  %vm709_vm6 = vcmp.le.s32.totalorder %v2891_v57, %v2873_v31  ;;  %vm914_vm7 = vcmask 130048   ;;  %vm1215_vm9 = vcmask 523264   ;;  %vm1218_vm10 = vcmask 785408   ;;  %p2123_p10 = scmp.ne.s32.totalorder %s2721_s13, 1 }
  0x6c   : > { %599 = vmatprep.subr.bf16.mxu0 %v2361_v13  ;;  %v675_v62 = vand.u32 1, %v673_v59  ;;  %vm2897_vm3 = vcmp.eq.s32.totalorder %v674_v61, 0  ;;  %v637_v13 = vld [vmem:[%s3181_s7 + $0x8] sm:$0xff] }
  0x6e   : > { %vm2901_vm4 = vcmp.eq.s32.totalorder %v675_v62, 0 }
  0x6f   : > { %600 = vmatpush1.bf16.msra.mxu0 %v2363_v14  ;;  %v638_v14 = vld [vmem:[%s3181_s7 + $0x10] sm:$0xff] }
  0x70   : > { %601 = vmatprep.subr.bf16.mxu0 %v2364_v15  ;;  %v639_v15 = vld [vmem:[%s3181_s7 + $0x18] sm:$0xff] }
  0x73   : > { %602 = vmatpush1.bf16.msra.mxu0 %v2366_v16 }
  0x74   : > { %603 = vmatprep.subr.bf16.mxu0 %v2367_v17 }
  0x77   : > { %604 = vmatpush1.bf16.msra.mxu0 %v2369_v18  ;;  %v2051_v18 = vld [vmem:[%s3181_s7 + $0x30] sm:$0xff] }
  0x78   : > { %605 = vmatprep.subr.bf16.mxu0 %v2370_v19  ;;  %v2052_v19 = vld [vmem:[%s3181_s7 + $0x38] sm:$0xff] }
  0x7b   : > { %606 = vmatpush1.bf16.msra.mxu0 %v2372_v21 }
  0x7c   : > { %607 = vmatprep.subr.bf16.mxu0 %v2373_v22 }
  0x7f   : > { %608 = vmatpush1.bf16.msra.mxu0 %v2375_v23 }
  0x80   : > { %2225 = vmatprep.subr.bf16.mxu0 %v2645_v53 }
  0xf3   : > { %v466_v24 = vpop.xlane.xlu0 %465 }
  0xf4   : > { %v470_v25 = vmul.f32 0.0078125, %v466_v24 }
  0xf6   : > { %v472_v26 = vadd.f32 1e-05, %v470_v25 }
  0xf7   : > { %v468_v27 = vpop.xlane.xlu0 %467 }
  0xf8   : > { %2448 = vrsqrt.f32 %v472_v26  ;;  %v471_v28 = vmul.f32 0.0078125, %v468_v27 }
  0xfa   : > { %v473_v30 = vadd.f32 1e-05, %v471_v28 }
  0xfc   : > { %2450 = vrsqrt.f32 %v473_v30 }
 0x102   : > { %v2449_v33 = vpop.eup %2448 }
 0x103   : > { %v476_v35 = vmul.f32 %v2449_v33, %v460_v3 }
 0x105   : > { %v482_v39 = vmul.f32 %v481_v36, %v476_v35 }
 0x106   : > { %v2451_v37 = vpop.eup %2450 }
 0x107   : > { %v477_v38 = vmul.f32 %v2451_v37, %v461_v4 }
 0x109   : > { %v483_v40 = vmul.f32 %v481_v36, %v477_v38 }
 0x10b   : > { %v484_v41 = vpack.c.bf16 %v483_v40, %v482_v39 }
 0x10d   : > { %626 = vmatmul.mubr.bf16.vlgmr.msra.gmra.mrb[0].mxu0 %v484_v41 }
 0x10e   : > { %2227 = vmatprep.mubr.msk.bf16.mxu0 %vm2646_vm0, %v2645_v53 }
 0x1e0   : > { %v627_v46 = vpop.f32.mrb[0].mxu0 }
 0x1e1   : > { %v628_v47 = vadd.f32 %v627_v46, %v506_v44  ;;  %v629_v48 = vpop.f32.mrb[1].mxu0 }
 0x1e2   : > { %v630_v49 = vadd.f32 %v629_v48, %v510_v45  ;;  %v631_v50 = vpop.f32.mrb[2].mxu0 }
 0x1e3   : > { %v632_v51 = vadd.f32 %v631_v50, %v506_v44  ;;  %v633_v52 = vpop.f32.mrb[3].mxu0  ;;  %645 = vrot.lane.b32.xlu1 %v628_v47, %s2643_s15  ;;  %v682_v26 = vmul.f32 %v636_v12, %v628_v47 }
 0x1e4   : > { %649 = vrot.lane.b32.xlu0 %v630_v49, %s2643_s15  ;;  %v634_v54 = vadd.f32 %v633_v52, %v510_v45  ;;  %v683_v27 = vmul.f32 %v637_v13, %v630_v49 }
 0x1e5   : > { %v684_v30 = vmul.f32 %v638_v14, %v632_v51 }
 0x1e6   : > { %v685_v32 = vmul.f32 %v639_v15, %v634_v54 }
 0x1e7   : > { %660 = vrot.lane.b32.xlu1 %v628_v47, %s2644_s18 }
 0x1eb   : > { %664 = vrot.lane.b32.xlu1 %v630_v49, %s2644_s18  ;;  %v708_v49 = vadd.s32 8, %v2873_v31  ;;  %v2434_v31 = vld [vmem:[%s2852_s16 + $0x48] sm:$0xff]  }
 0x1ed   : > { %vm710_vm8 = vcmp.le.s32.totalorder %v2891_v57, %v708_v49 }
 0x1ef   : > { %647 = vrot.lane.b32.xlu1 %v632_v51, %s2643_s15 }
 0x1f3   : > { %662 = vrot.lane.b32.xlu1 %v632_v51, %s2644_s18 }
 0x1f7   : > { %651 = vrot.lane.b32.xlu1 %v634_v54, %s2643_s15 }
 0x1fb   : > { %666 = vrot.lane.b32.xlu1 %v634_v54, %s2644_s18 }
 0x255   : > { %v646_v55 = vpop.permute.xlu1 %645 }
 0x256   : > { %v650_v0 = vpop.permute.xlu0 %649 }
 0x257   : > { %v656_v5 = vsel %vm655_vm2, %v646_v55, %v650_v0  ;;  %v658_v6 = vsel %vm655_vm2, %v650_v0, %v646_v55 }
 0x259   : > { %v661_v56 = vpop.permute.xlu1 %660 }
 0x25d   : > { %v665_v58 = vpop.permute.xlu1 %664 }
 0x25e   : > { %v669_v3 = vsel %vm668_vm1, %v661_v56, %v665_v58  ;;  %v671_v4 = vsel %vm668_vm1, %v665_v58, %v661_v56 }
 0x25f   : > { %v678_v10 = vsel %vm2897_vm3, %v669_v3, %v658_v6  ;;  %v679_v11 = vsel %vm2901_vm4, %v671_v4, %v656_v5 }
 0x260   : > { %v686_v16 = vmul.f32 %v2049_v8, %v678_v10  ;;  %v687_v17 = vmul.f32 %v2050_v9, %v679_v11 }
 0x261   : > { %v648_v60 = vpop.permute.xlu1 %647 }
 0x262   : > { %v690_v36 = vadd.f32 %v686_v16, %v682_v26  ;;  %v691_v38 = vadd.f32 %v687_v17, %v683_v27 }
 0x265   : > { %v663_v63 = vpop.permute.xlu1 %662 }
 0x269   : > { %v652_v7 = vpop.permute.xlu1 %651 }
 0x26a   : > { %v657_v22 = vsel %vm655_vm2, %v648_v60, %v652_v7  ;;  %v659_v23 = vsel %vm655_vm2, %v652_v7, %v648_v60 }
 0x26d   : > { %v667_v21 = vpop.permute.xlu1 %666 }
 0x26e   : > { %v670_v24 = vsel %vm668_vm1, %v663_v63, %v667_v21  ;;  %v672_v25 = vsel %vm668_vm1, %v667_v21, %v663_v63 }
 0x26f   : > { %v680_v28 = vsel %vm2897_vm3, %v670_v24, %v659_v23  ;;  %v681_v29 = vsel %vm2901_vm4, %v672_v25, %v657_v22 }
 0x270   : > { %v688_v33 = vmul.f32 %v2051_v18, %v680_v28  ;;  %v689_v35 = vmul.f32 %v2052_v19, %v681_v29 }
 0x272   : > { %v692_v37 = vadd.f32 %v688_v33, %v684_v30  ;;  %v693_v39 = vadd.f32 %v689_v35, %v685_v32 }
 0x274   : > { %v2953_v40 = vpack.c.bf16 %v693_v39, %v691_v38  ;;  %v694_v41 = vpack.c.bf16 %v692_v37, %v690_v36 }
 0x276   : > { %704 = vrot.lane.b32.xlu0 %v2953_v40, %s2647_s22  ;;  %697 = vrot.lane.b32.xlu1 %v694_v41, %s2647_s22  ;;  %v716_v42 = vsel %vm711_vm5, %v2953_v40, 0 }
 0x277   : > { %2202 = vmatpush3.bf16.xpose.msra.mxu1 %v716_v42 }
 0x278   : > { %2207 = vmatprep.subr.bf16.mxu1 %v2645_v53 }
 0x27a   : > { %701 = vrot.lane.b32.xlu0 %v694_v41, %s2648_s23  ;;  %699 = vrot.lane.b32.xlu1 %v694_v41, %s2649_s26 }
 0x27e   : > { %2204 = vmatmul.mubr.msk.bf16.vlgmr.msra.gmra.mrb[0].mxu1 %vm711_vm5, %v694_v41 }
 0x27f   : > { %2208 = vmatpush3.bf16.xpose.msra.mxu1 %v716_v42  ;;  %2209 = vmatprep.mubr.msk.bf16.mxu1 %vm2646_vm0, %v2645_v53 }
 0x280   : > { %2213 = vmatprep.subr.bf16.mxu1 %v2645_v53 }
 0x2e8   : > { %v2967_v44 = vpop.permute.xlu0 %704  ;;  %v698_v45 = vpop.permute.xlu1 %697 }
 0x2e9   : > { %v807_v46 = vsel %vm711_vm5, %v2967_v44, 0  ;;  %2210 = vmatmul.mubr.msk.bf16.vlgmr.msra.gmra.mrb[4].mxu1 %vm711_vm5, %v698_v45 }
 0x2ea   : > { %2214 = vmatpush3.bf16.xpose.msra.mxu1 %v807_v46  ;;  %2215 = vmatprep.mubr.msk.bf16.mxu1 %vm2646_vm0, %v2645_v53 }
 0x2eb   : > { %2219 = vmatprep.subr.bf16.mxu1 %v2645_v53 }
 0x2ec   : > { %v700_v47 = vpop.permute.xlu1 %699  ;;  %v702_v48 = vpop.permute.xlu0 %701 }
 0x2f1   : > { %2216 = vmatmul.mubr.msk.bf16.vlgmr.msra.gmra.mrb[8].mxu1 %vm711_vm5, %v700_v47 }
 0x2f2   : > { %2220 = vmatpush3.bf16.xpose.msra.mxu1 %v807_v46  ;;  %2221 = vmatprep.mubr.msk.bf16.mxu1 %vm2646_vm0, %v2645_v53 }
 0x2f3   : > { %2231 = vmatprep.subr.bf16.mxu1 %v2645_v53 }
 0x2f9   : > { %2222 = vmatmul.mubr.msk.bf16.vlgmr.msra.gmra.mrb[12].mxu1 %vm711_vm5, %v702_v48 }
 0x2fa   : > { %2233 = vmatprep.mubr.msk.bf16.mxu1 %vm2646_vm0, %v2645_v53 }
 0x351   : > { %v752_v50 = vpop.f32.mrb[0].mxu1 }
 0x352   : > { %v894_v51 = vmul.f32 0.17677669, %v752_v50  ;;  %v2205_v52 = vpop.f32.mrb[1].mxu1 }
 0x353   : > { %v755_v54 = vpop.f32.mrb[2].mxu1 }
 0x354   : > { %v895_v55 = vmul.f32 0.17677669, %v755_v54  ;;  %v2206_v56 = vpop.f32.mrb[3].mxu1  ;;  %v906_v58 = vsel %vm709_vm6, %v894_v51, -1e+30 }
 0x355   : > { %v915_v59 = vsel %vm914_vm7, %v906_v58, -inf }
 0x356   : > { %916 = vmax.xlane.f32.xlu1 %v915_v59  ;;  %v907_v60 = vsel %vm710_vm8, %v895_v55, -1e+30 }
 0x357   : > { %v918_v61 = vsel %vm914_vm7, %v907_v60, -inf }
 0x358   : > { %919 = vmax.xlane.f32.xlu0 %v918_v61 }
 0x3bc   : > { %v796_v62 = vpop.f32.mrb[4].mxu1 }
 0x3bd   : > { %v896_v63 = vmul.f32 0.17677669, %v796_v62  ;;  %v2211_v0 = vpop.f32.mrb[5].mxu1 }
 0x3be   : > { %v799_v1 = vpop.f32.mrb[6].mxu1 }
 0x3bf   : > { %v897_v2 = vmul.f32 0.17677669, %v799_v1  ;;  %v2212_v3 = vpop.f32.mrb[7].mxu1  ;;  %v908_v4 = vsel %vm709_vm6, %v896_v63, -1e+30 }
 0x3c0   : > { %v921_v5 = vsel %vm914_vm7, %v908_v4, -inf }
 0x3c1   : > { %922 = vmax.xlane.f32.xlu0 %v921_v5  ;;  %v909_v6 = vsel %vm710_vm8, %v897_v2, -1e+30 }
 0x3c2   : > { %v924_v7 = vsel %vm914_vm7, %v909_v6, -inf }
 0x3c3   : > { %925 = vmax.xlane.f32.xlu1 %v924_v7 }
 0x3c4   : > { %v843_v8 = vpop.f32.mrb[8].mxu1 }
 0x3c5   : > { %v898_v9 = vmul.f32 0.17677669, %v843_v8  ;;  %v2217_v10 = vpop.f32.mrb[9].mxu1 }
 0x3c6   : > { %v846_v11 = vpop.f32.mrb[10].mxu1 }
 0x3c7   : > { %v899_v12 = vmul.f32 0.17677669, %v846_v11  ;;  %v2218_v13 = vpop.f32.mrb[11].mxu1  ;;  %v910_v14 = vsel %vm709_vm6, %v898_v9, -1e+30 }
 0x3c8   : > { %v927_v15 = vsel %vm914_vm7, %v910_v14, -inf }
 0x3c9   : > { %928 = vmax.xlane.f32.xlu0 %v927_v15  ;;  %v911_v16 = vsel %vm710_vm8, %v899_v12, -1e+30 }
 0x3ca   : > { %v930_v17 = vsel %vm914_vm7, %v911_v16, -inf }
 0x3cb   : > { %931 = vmax.xlane.f32.xlu1 %v930_v17 }
 0x3cc   : > { %v887_v18 = vpop.f32.mrb[12].mxu1 }
 0x3cd   : > { %v900_v19 = vmul.f32 0.17677669, %v887_v18  ;;  %v2223_v21 = vpop.f32.mrb[13].mxu1 }
 0x3ce   : > { %v890_v22 = vpop.f32.mrb[14].mxu1 }
 0x3cf   : > { %v901_v23 = vmul.f32 0.17677669, %v890_v22  ;;  %v2224_v24 = vpop.f32.mrb[15].mxu1  ;;  %v912_v25 = vsel %vm709_vm6, %v900_v19, -1e+30 }
 0x3d0   : > { %v933_v26 = vsel %vm914_vm7, %v912_v25, -inf }
 0x3d1   : > { %934 = vmax.xlane.f32.xlu0 %v933_v26  ;;  %v913_v27 = vsel %vm710_vm8, %v901_v23, -1e+30 }
 0x3d2   : > { %v936_v28 = vsel %vm914_vm7, %v913_v27, -inf }
 0x3d3   : > { %937 = vmax.xlane.f32.xlu1 %v936_v28 }
 0x3e3   : > { %v917_v29 = vpop.xlane.xlu1 %916 }
 0x3e4   : > { %v939_v30 = vsub.f32 %v906_v58, %v917_v29 }
 0x3e5   : > { %v920_v32 = vpop.xlane.xlu0 %919 }
 0x3e6   : > { %v947_v33 = vmul.f32 1.442695, %v939_v30  ;;  %v940_v35 = vsub.f32 %v907_v60, %v920_v32 }
 0x3e8   : > { %2452 = vpow2.f32 %v947_v33  ;;  %v949_v36 = vmul.f32 1.442695, %v940_v35 }
 0x3ea   : > { %2454 = vpow2.f32 %v949_v36 }
 0x3f2   : > { %v3014_v37 = vpop.eup %2452 }
 0x3f3   : > { %v963_v38 = vsel %vm914_vm7, %v3014_v37, 0.0 }
 0x3f4   : > { %v3018_v39 = vpop.eup %2454  ;;  %964 = vadd.xlane.f32.xlu0 %v963_v38 }
 0x3f5   : > { %v966_v57 = vsel %vm914_vm7, %v3018_v39, 0.0 }
 0x3f6   : > { %967 = vadd.xlane.f32.xlu1 %v966_v57 }
 0x44e   : > { %v923_v41 = vpop.xlane.xlu0 %922 }
 0x44f   : > { %v941_v42 = vsub.f32 %v908_v4, %v923_v41 }
 0x450   : > { %v926_v45 = vpop.xlane.xlu1 %925 }
 0x451   : > { %v951_v46 = vmul.f32 1.442695, %v941_v42  ;;  %v942_v47 = vsub.f32 %v909_v6, %v926_v45  ;;  %v2376_v42 = vld [vmem:[%s2842_s17] sm:$0xff]   ;;  %v2377_v45 = vld [vmem:[%s2842_s17 + $0x8] sm:$0xff]  }
 0x453   : > { %2456 = vpow2.f32 %v951_v46  ;;  %v953_v48 = vmul.f32 1.442695, %v942_v47  ;;  %v2378_v46 = vld [vmem:[%s2842_s17 + $0x10] sm:$0xff]   ;;  %v2379_v47 = vld [vmem:[%s2842_s17 + $0x18] sm:$0xff]  }
 0x455   : > { %2458 = vpow2.f32 %v953_v48  ;;  %v2380_v48 = vld [vmem:[%s2842_s17 + $0x20] sm:$0xff]  }
 0x456   : > { %v929_v49 = vpop.xlane.xlu0 %928 }
 0x457   : > { %v943_v50 = vsub.f32 %v910_v14, %v929_v49  ;;  %v2381_v49 = vld [vmem:[%s2842_s17 + $0x28] sm:$0xff]  }
 0x458   : > { %v932_v51 = vpop.xlane.xlu1 %931 }
 0x459   : > { %v955_v52 = vmul.f32 1.442695, %v943_v50  ;;  %v944_v54 = vsub.f32 %v911_v16, %v932_v51  ;;  %v2382_v50 = vld [vmem:[%s2842_s17 + $0x30] sm:$0xff]  }
 0x45b   : > { %2460 = vpow2.f32 %v955_v52  ;;  %v957_v55 = vmul.f32 1.442695, %v944_v54 }
 0x45d   : > { %v2457_v56 = vpop.eup %2456  ;;  %2462 = vpow2.f32 %v957_v55 }
 0x45e   : > { %v935_v58 = vpop.xlane.xlu0 %934  ;;  %v969_v59 = vsel %vm914_vm7, %v2457_v56, 0.0 }
 0x45f   : > { %v2459_v60 = vpop.eup %2458  ;;  %v945_v61 = vsub.f32 %v912_v25, %v935_v58  ;;  %970 = vadd.xlane.f32.xlu0 %v969_v59  ;;  %v2383_v59 = vld [vmem:[%s2842_s17 + $0x38] sm:$0xff]  }
 0x460   : > { %v938_v62 = vpop.xlane.xlu1 %937  ;;  %v972_v63 = vsel %vm914_vm7, %v2459_v60, 0.0 }
 0x461   : > { %v959_v0 = vmul.f32 1.442695, %v945_v61  ;;  %v946_v1 = vsub.f32 %v913_v27, %v938_v62  ;;  %973 = vadd.xlane.f32.xlu1 %v972_v63 }
 0x463   : > { %2464 = vpow2.f32 %v959_v0  ;;  %v961_v2 = vmul.f32 1.442695, %v946_v1 }
 0x465   : > { %v2461_v3 = vpop.eup %2460  ;;  %2466 = vpow2.f32 %v961_v2 }
 0x466   : > { %v975_v4 = vsel %vm914_vm7, %v2461_v3, 0.0 }
 0x467   : > { %v2463_v5 = vpop.eup %2462  ;;  %976 = vadd.xlane.f32.xlu0 %v975_v4 }
 0x468   : > { %v978_v6 = vsel %vm914_vm7, %v2463_v5, 0.0 }
 0x469   : > { %979 = vadd.xlane.f32.xlu1 %v978_v6 }
 0x46d   : > { %v2465_v7 = vpop.eup %2464 }
 0x46e   : > { %v981_v8 = vsel %vm914_vm7, %v2465_v7, 0.0 }
 0x46f   : > { %v2467_v9 = vpop.eup %2466  ;;  %982 = vadd.xlane.f32.xlu0 %v981_v8 }
 0x470   : > { %v984_v10 = vsel %vm914_vm7, %v2467_v9, 0.0 }
 0x471   : > { %985 = vadd.xlane.f32.xlu1 %v984_v10 }
 0x481   : > { %v965_v12 = vpop.xlane.xlu0 %964 }
 0x482   : > { %1098 = vrot.lane.b32.xlu1 %v2967_v44, %s2649_s26 }
 0x483   : > { %v968_v11 = vpop.xlane.xlu1 %967 }
 0x484   : > { %2468 = vrcp.f32 %v968_v11 }
 0x485   : > { %1007 = vrot.lane.b32.xlu0 %v2953_v40, %s2649_s26 }
 0x48e   : > { %v2469_v17 = vpop.eup %2468 }
 0x48f   : > { %v990_v40 = vmul.f32 %v2469_v17, %v3018_v39 }
 0x4ec   : > { %v971_v14 = vpop.xlane.xlu0 %970 }
 0x4ee   : > { %v974_v13 = vpop.xlane.xlu1 %973 }
 0x4ef   : > { %2470 = vrcp.f32 %v974_v13 }
 0x4f0   : > { %2472 = vrcp.f32 %v965_v12 }
 0x4f1   : > { %2474 = vrcp.f32 %v971_v14 }
 0x4f4   : > { %v977_v16 = vpop.xlane.xlu0 %976 }
 0x4f6   : > { %v980_v15 = vpop.xlane.xlu1 %979 }
 0x4f7   : > { %2476 = vrcp.f32 %v980_v15 }
 0x4f8   : > { %2478 = vrcp.f32 %v977_v16 }
 0x4f9   : > { %v2471_v18 = vpop.eup %2470 }
 0x4fa   : > { %v2473_v19 = vpop.eup %2472  ;;  %v994_v22 = vmul.f32 %v2471_v18, %v2459_v60 }
 0x4fb   : > { %v2475_v44 = vpop.eup %2474  ;;  %v988_v24 = vmul.f32 %v2473_v19, %v3014_v37 }
 0x4fc   : > { %v983_v21 = vpop.xlane.xlu0 %982  ;;  %v992_v25 = vmul.f32 %v2475_v44, %v2457_v56 }
 0x4fd   : > { %2480 = vrcp.f32 %v983_v21  ;;  %v1003_v27 = vpack.c.bf16 %v990_v40, %v988_v24  ;;  %v2386_v24 = vld [vmem:[%s2847_s0 + $0x4] ss:$16 sps:$4 sm:$0xff]  }
 0x4fe   : > { %v986_v23 = vpop.xlane.xlu1 %985  ;;  %v1004_v28 = vpack.c.bf16 %v994_v22, %v992_v25  ;;  %v2387_v25 = vld [vmem:[%s2847_s0 + $0x8] ss:$16 sps:$4 sm:$0xff]  }
 0x4ff   : > { %2482 = vrcp.f32 %v986_v23  ;;  %v2384_v23 = vld [vmem:[%s2847_s0] ss:$16 sps:$4 sm:$0xff]  }
 0x500   : > { %v1008_v26 = vpop.permute.xlu0 %1007 }
 0x501   : > { %2226 = vmatpush3.bf16.msra.mxu0 %v1008_v26  ;;  %2232 = vmatpush3.bf16.msra.mxu1 %v1008_v26  ;;  %v2477_v29 = vpop.eup %2476  ;;  %v2389_v26 = vld [vmem:[%s2847_s0 + $0xc] ss:$16 sps:$4 sm:$0xff]  }
 0x502   : > { %2237 = vmatprep.subr.bf16.mxu0 %v2645_v53  ;;  %2243 = vmatprep.subr.bf16.mxu1 %v2645_v53  ;;  %v1099_v30 = vpop.permute.xlu1 %1098  ;;  %v2479_v32 = vpop.eup %2478  ;;  %v998_v33 = vmul.f32 %v2477_v29, %v2463_v5  ;;  %v2390_v29 = vld [vmem:[%s2847_s0 + $0x20] ss:$16 sps:$4 sm:$0xff]  }
 0x503   : > { %v996_v36 = vmul.f32 %v2479_v32, %v2461_v3  ;;  %v2398_v32 = vld [vmem:[%s2847_s0 + $0x44] ss:$16 sps:$4 sm:$0xff]  }
 0x504   : > { %2228 = vmatmul.mubr.msk.bf16.vlgmr.msra.gmra.mrb[4].mxu0 %vm914_vm7, %v1003_v27  ;;  %2234 = vmatmul.mubr.msk.bf16.vlgmr.msra.gmra.mrb[16].mxu1 %vm914_vm7, %v1004_v28  ;;  %v2392_v27 = vld [vmem:[%s2847_s0 + $0x24] ss:$16 sps:$4 sm:$0xff]   ;;  %v2395_v28 = vld [vmem:[%s2847_s0 + $0x2c] ss:$16 sps:$4 sm:$0xff]  }
 0x505   : > { %2238 = vmatpush3.bf16.msra.mxu0 %v1099_v30  ;;  %2244 = vmatpush3.bf16.msra.mxu1 %v1099_v30  ;;  %v1005_v57 = vpack.c.bf16 %v998_v33, %v996_v36  ;;  %v2393_v30 = vld [vmem:[%s2847_s0 + $0x28] ss:$16 sps:$4 sm:$0xff]   ;;  %v2401_v33 = vld [vmem:[%s2847_s0 + $0x4c] ss:$16 sps:$4 sm:$0xff]  }
 0x506   : > { %2239 = vmatprep.mubr.msk.bf16.mxu0 %vm2646_vm0, %v2645_v53  ;;  %2245 = vmatprep.mubr.msk.bf16.mxu1 %vm2646_vm0, %v2645_v53 }
 0x507   : > { %v2481_v35 = vpop.eup %2480  ;;  %2249 = vmatprep.subr.bf16.mxu0 %v2645_v53  ;;  %1542 = vmatprep.subr.bf16.mxu1 %v2386_v24  ;;  %v2441_v24 = vld [vmem:[%s2852_s16 + $0x20] sm:$0xff]  }
 0x508   : > { %v1000_v38 = vmul.f32 %v2481_v35, %v2465_v7  ;;  %v2399_v35 = vld [vmem:[%s2847_s0 + $0x48] ss:$16 sps:$4 sm:$0xff]  }
 0x509   : > { %v2483_v37 = vpop.eup %2482 }
 0x50a   : > { %v1002_v39 = vmul.f32 %v2483_v37, %v2467_v9  ;;  %v2504_v37 = vld [vmem:[#allocation2] sm:$0xff] }
 0x50c   : > { %2240 = vmatmul.mubr.msk.bf16.vlgmr.msra.gmra.mrb[8].mxu0 %vm914_vm7, %v1005_v57  ;;  %v1006_v41 = vpack.c.bf16 %v1002_v39, %v1000_v38 }
 0x50d   : > { %2265 = vmatprep.mubr.msk.bf16.mxu0 %vm2646_vm0, %v2645_v53  ;;  %2250 = vmatpush3.bf16.msra.mxu0 %v2376_v42 }
 0x50e   : > { %2246 = vmatmul.mubr.msk.bf16.vlgmr.msra.gmra.mrb[20].mxu1 %vm914_vm7, %v1006_v41  ;;  %2251 = vmatprep.subr.bf16.mxu0 %v2645_v53  ;;  %v2505_v41 = vld [vmem:[#allocation2 + $0x8] sm:$0xff] }
 0x50f   : > { %1574 = vmatprep.mubr.bf16.mxu1 %v2642_v20  ;;  %1543 = vmatpush1.bf16.msra.mxu1 %v2384_v23  ;;  %v2440_v23 = vld [vmem:[%s2852_s16 + $0x60] sm:$0xff]  }
 0x510   : > { %1544 = vmatprep.subr.bf16.mxu1 %v2392_v27  ;;  %v2444_v27 = vld [vmem:[%s2852_s16 + $0x70] sm:$0xff]  }
 0x511   : > { %2252 = vmatpush3.bf16.msra.mxu0 %v2377_v45 }
 0x512   : > { %2253 = vmatprep.subr.bf16.mxu0 %v2645_v53 }
 0x513   : > { %1545 = vmatpush1.bf16.msra.mxu1 %v2390_v29  ;;  %v2446_v29 = vld [vmem:[%s2852_s16 + $0x78] sm:$0xff]  }
 0x514   : > { %1546 = vmatprep.subr.bf16.mxu1 %v2398_v32 }
 0x515   : > { %2254 = vmatpush3.bf16.msra.mxu0 %v2378_v46 }
 0x516   : > { %2255 = vmatprep.subr.bf16.mxu0 %v2645_v53 }
 0x519   : > { %2256 = vmatpush3.bf16.msra.mxu0 %v2379_v47 }
 0x51a   : > { %2257 = vmatprep.subr.bf16.mxu0 %v2645_v53 }
 0x51d   : > { %2258 = vmatpush3.bf16.msra.mxu0 %v2380_v48  ;;  %v2404_v48 = vld [vmem:[%s2847_s0 + $0x64] ss:$16 sps:$4 sm:$0xff]  }
 0x51e   : > { %2259 = vmatprep.subr.bf16.mxu0 %v2645_v53 }
 0x521   : > { %2260 = vmatpush3.bf16.msra.mxu0 %v2381_v49  ;;  %v2407_v49 = vld [vmem:[%s2847_s0 + $0x6c] ss:$16 sps:$4 sm:$0xff]  }
 0x522   : > { %2261 = vmatprep.subr.bf16.mxu0 %v2645_v53 }
 0x525   : > { %2262 = vmatpush3.bf16.msra.mxu0 %v2382_v50  ;;  %v2402_v50 = vld [vmem:[%s2847_s0 + $0x60] ss:$16 sps:$4 sm:$0xff]  }
 0x526   : > { %2263 = vmatprep.subr.bf16.mxu0 %v2645_v53 }
 0x529   : > { %2264 = vmatpush3.bf16.msra.mxu0 %v2383_v59  ;;  %v2419_v59 = vld [vmem:[%s2847_s0 + $0xac] ss:$16 sps:$4 sm:$0xff]  }
 0x52a   : > { %1585 = vmatprep.subr.bf16.mxu0 %v2389_v26  ;;  %v2443_v26 = vld [vmem:[%s2852_s16 + $0x28] sm:$0xff]  }
 0x5d7   : > { %v1047_v51 = vpop.f32.mrb[4].mxu0  ;;  %v1091_v52 = vpop.f32.mrb[16].mxu1 }
 0x5d8   : > { %v2229_v54 = vpop.f32.mrb[5].mxu0  ;;  %v2235_v55 = vpop.f32.mrb[17].mxu1 }
 0x5d9   : > { %v1050_v56 = vpop.f32.mrb[6].mxu0  ;;  %v1094_v58 = vpop.f32.mrb[18].mxu1  ;;  %v2413_v54 = vld [vmem:[%s2847_s0 + $0x8c] ss:$16 sps:$4 sm:$0xff]   ;;  %v2408_v55 = vld [vmem:[%s2847_s0 + $0x80] ss:$16 sps:$4 sm:$0xff]  }
 0x5da   : > { %v2337_v60 = vpack.i.bf16 %v1094_v58, %v1091_v52  ;;  %v2230_v61 = vpop.f32.mrb[7].mxu0  ;;  %v2236_v62 = vpop.f32.mrb[19].mxu1  ;;  %v2410_v52 = vld [vmem:[%s2847_s0 + $0x84] ss:$16 sps:$4 sm:$0xff]  }
 0x5db   : > { %v2416_v58 = vld [vmem:[%s2847_s0 + $0xa4] ss:$16 sps:$4 sm:$0xff]   ;;  %v2417_v61 = vld [vmem:[%s2847_s0 + $0xa8] ss:$16 sps:$4 sm:$0xff]  }
 0x5dc   : > { %2338 = vrot.lane.b32.xlu1 %v2337_v60, %s2648_s23  ;;  %v2414_v60 = vld [vmem:[%s2847_s0 + $0xa0] ss:$16 sps:$4 sm:$0xff]   ;;  %v2422_v62 = vld [vmem:[%s2847_s0 + $0xc4] ss:$16 sps:$4 sm:$0xff]  }
 0x5df   : > { %v1138_v63 = vpop.f32.mrb[8].mxu0 }
 0x5e0   : > { %v2241_v0 = vpop.f32.mrb[9].mxu0 }
 0x5e1   : > { %v1141_v1 = vpop.f32.mrb[10].mxu0  ;;  %v1182_v2 = vpop.f32.mrb[20].mxu1  ;;  %v2420_v0 = vld [vmem:[%s2847_s0 + $0xc0] ss:$16 sps:$4 sm:$0xff]  }
 0x5e2   : > { %v2342_v3 = vpack.i.bf16 %v1141_v1, %v1138_v63  ;;  %v2242_v4 = vpop.f32.mrb[11].mxu0  ;;  %v2247_v5 = vpop.f32.mrb[21].mxu1  ;;  %v2425_v63 = vld [vmem:[%s2847_s0 + $0xcc] ss:$16 sps:$4 sm:$0xff]   ;;  %v2423_v1 = vld [vmem:[%s2847_s0 + $0xc8] ss:$16 sps:$4 sm:$0xff]  }
 0x5e3   : > { %v1185_v6 = vpop.f32.mrb[22].mxu1  ;;  %v2426_v4 = vld [vmem:[%s2847_s0 + $0xe0] ss:$16 sps:$4 sm:$0xff]   ;;  %v2429_v5 = vld [vmem:[%s2847_s0 + $0xe8] ss:$16 sps:$4 sm:$0xff]  }
 0x5e4   : > { %v2347_v7 = vpack.i.bf16 %v1185_v6, %v1182_v2  ;;  %2343 = vrot.lane.b32.xlu0 %v2342_v3, %s2649_s26  ;;  %v2248_v53 = vpop.f32.mrb[23].mxu1  ;;  %v2428_v2 = vld [vmem:[%s2847_s0 + $0xe4] ss:$16 sps:$4 sm:$0xff]   ;;  %v2431_v3 = vld [vmem:[%s2847_s0 + $0xec] ss:$16 sps:$4 sm:$0xff]  }
 0x5e6   : > { %2348 = vrot.lane.b32.xlu1 %v2347_v7, %s2647_s22 }
 0x64e   : > { %v2339_v8 = vpop.permute.xlu1 %2338 }
 0x64f   : > { %v2341_v9 = vunpack.i.h.bf16 %v2339_v8  ;;  %v2340_v10 = vunpack.i.l.bf16 %v2339_v8 }
 0x651   : > { %v1214_v14 = vsel %vm711_vm5, %v1050_v56, %v2341_v9  ;;  %v1213_v15 = vsel %vm711_vm5, %v1047_v51, %v2340_v10  ;;  %v2405_v51 = vld [vmem:[%s2847_s0 + $0x68] ss:$16 sps:$4 sm:$0xff]  }
 0x652   : > { %v2411_v56 = vld [vmem:[%s2847_s0 + $0x88] ss:$16 sps:$4 sm:$0xff]  }
 0x656   : > { %v2344_v11 = vpop.permute.xlu0 %2343 }
 0x657   : > { %v2346_v12 = vunpack.i.h.bf16 %v2344_v11  ;;  %v2345_v13 = vunpack.i.l.bf16 %v2344_v11 }
 0x658   : > { %v2349_v16 = vpop.permute.xlu1 %2348 }
 0x659   : > { %v1216_v17 = vsel %vm1215_vm9, %v1213_v15, %v2345_v13  ;;  %v1217_v18 = vsel %vm1215_vm9, %v1214_v14, %v2346_v12  ;;  %v2351_v19 = vunpack.i.h.bf16 %v2349_v16  ;;  %v2350_v21 = vunpack.i.l.bf16 %v2349_v16 }
 0x65a   : > { %v1346_v12 = vrot.slane %v2877_v34, %v509_v43  ;;  %v2435_v34 = vld [vmem:[%s2852_s16 + $0x8] sm:$0xff]   ;;  %v2436_v43 = vld [vmem:[%s2852_s16 + $0x50] sm:$0xff]  }
 0x65b   : > { %v1220_v44 = vsel %vm1218_vm10, %v1217_v18, %v2351_v19  ;;  %v1219_v40 = vsel %vm1218_vm10, %v1216_v17, %v2350_v21  ;;  %v2432_v19 = vld [vmem:[%s2852_s16 + $0x40] sm:$0xff]  }
 0x65c   : > { %v1221_v22 = vpack.c.bf16 %v1220_v44, %v1219_v40  ;;  %v2433_v21 = vld [vmem:[%s2852_s16] sm:$0xff]   ;;  %v2437_v44 = vld [vmem:[%s2852_s16 + $0x10] sm:$0xff]   ;;  %v2438_v40 = vld [vmem:[%s2852_s16 + $0x58] sm:$0xff]  }
 0x65e   : > { %2266 = vmatmul.mubr.bf16.vlgmr.msra.gmra.mrb[12].mxu0 %v1221_v22  ;;  %v2439_v22 = vld [vmem:[%s2852_s16 + $0x18] sm:$0xff]  }
 0x65f   : > { %1617 = vmatprep.mubr.bf16.mxu0 %v2642_v20  ;;  %1586 = vmatpush1.bf16.msra.mxu0 %v2387_v25  ;;  %v2396_v20 = vld [vmem:[%s2847_s0 + $0x40] ss:$16 sps:$4 sm:$0xff]   ;;  %v2442_v25 = vld [vmem:[%s2852_s16 + $0x68] sm:$0xff]  }
 0x660   : > { %1587 = vmatprep.subr.bf16.mxu0 %v2395_v28  ;;  %1547 = vmatpush1.bf16.msra.mxu1 %v2396_v20  ;;  %v2445_v28 = vld [vmem:[%s2852_s16 + $0x30] sm:$0xff]  }
 0x661   : > { %1548 = vmatprep.subr.bf16.mxu1 %v2404_v48 }
 0x663   : > { %1588 = vmatpush1.bf16.msra.mxu0 %v2393_v30  ;;  %v2447_v30 = vld [vmem:[%s2852_s16 + $0x38] sm:$0xff]  }
 0x664   : > { %1589 = vmatprep.subr.bf16.mxu0 %v2401_v33  ;;  %1549 = vmatpush1.bf16.msra.mxu1 %v2402_v50 }
 0x665   : > { %1550 = vmatprep.subr.bf16.mxu1 %v2410_v52 }
 0x667   : > { %1590 = vmatpush1.bf16.msra.mxu0 %v2399_v35 }
 0x668   : > { %1591 = vmatprep.subr.bf16.mxu0 %v2407_v49  ;;  %1551 = vmatpush1.bf16.msra.mxu1 %v2408_v55 }
 0x669   : > { %1552 = vmatprep.subr.bf16.mxu1 %v2416_v58 }
 0x66b   : > { %1592 = vmatpush1.bf16.msra.mxu0 %v2405_v51 }
 0x66c   : > { %1593 = vmatprep.subr.bf16.mxu0 %v2413_v54  ;;  %1553 = vmatpush1.bf16.msra.mxu1 %v2414_v60 }
 0x66d   : > { %1554 = vmatprep.subr.bf16.mxu1 %v2422_v62 }
 0x66f   : > { %1594 = vmatpush1.bf16.msra.mxu0 %v2411_v56 }
 0x670   : > { %1595 = vmatprep.subr.bf16.mxu0 %v2419_v59  ;;  %1555 = vmatpush1.bf16.msra.mxu1 %v2420_v0 }
 0x671   : > { %1556 = vmatprep.subr.bf16.mxu1 %v2428_v2 }
 0x673   : > { %1596 = vmatpush1.bf16.msra.mxu0 %v2417_v61 }
 0x674   : > { %1597 = vmatprep.subr.bf16.mxu0 %v2425_v63  ;;  %1557 = vmatpush1.bf16.msra.mxu1 %v2426_v4 }
 0x675   : > { %2179 = vmatprep.subr.bf16.mxu1 %v2432_v19 }
 0x677   : > { %1598 = vmatpush1.bf16.msra.mxu0 %v2423_v1 }
 0x678   : > { %1599 = vmatprep.subr.bf16.mxu0 %v2431_v3 }
 0x67b   : > { %1600 = vmatpush1.bf16.msra.mxu0 %v2429_v5 }
 0x731   : > { %v1320_v36 = vpop.f32.mrb[12].mxu0 }
 0x732   : > { %v3081_v38 = vadd.f32 %v2504_v37, %v1320_v36  ;;  %v2267_v39 = vpop.f32.mrb[13].mxu0 }
 0x733   : > { %v1323_v57 = vpop.f32.mrb[14].mxu0 }
 0x734   : > { %v3083_v42 = vadd.f32 %v2505_v41, %v1323_v57  ;;  %v2268_v45 = vpop.f32.mrb[15].mxu0  ;;  %v1329_v46 = vmul.f32 %v3081_v38, %v3081_v38 }
 0x736   : > { %1331 = vadd.xlane.f32.xlu0 %v1329_v46  ;;  %v1330_v47 = vmul.f32 %v3083_v42, %v3083_v42 }
 0x738   : > { %1333 = vadd.xlane.f32.xlu1 %v1330_v47 }
 0x7c3   : > { %v1332_v6 = vpop.xlane.xlu0 %1331 }
 0x7c4   : > { %v1335_v7 = vmul.f32 0.0078125, %v1332_v6 }
 0x7c5   : > { %v1334_v53 = vpop.xlane.xlu1 %1333 }
 0x7c6   : > { %v1337_v8 = vadd.f32 1e-05, %v1335_v7  ;;  %v1336_v9 = vmul.f32 0.0078125, %v1334_v53 }
 0x7c8   : > { %2484 = vrsqrt.f32 %v1337_v8  ;;  %v1338_v10 = vadd.f32 1e-05, %v1336_v9 }
 0x7ca   : > { %2486 = vrsqrt.f32 %v1338_v10 }
 0x7d2   : > { %v2485_v11 = vpop.eup %2484 }
 0x7d3   : > { %v1341_v13 = vmul.f32 %v2485_v11, %v3081_v38 }
 0x7d4   : > { %v2487_v14 = vpop.eup %2486 }
 0x7d5   : > { %v1342_v15 = vmul.f32 %v2487_v14, %v3083_v42  ;;  %v1347_v16 = vmul.f32 %v1346_v12, %v1341_v13 }
 0x7d7   : > { %v1348_v17 = vmul.f32 %v1346_v12, %v1342_v15 }
 0x7d9   : > { %v1349_v18 = vpack.c.bf16 %v1348_v17, %v1347_v16 }
 0x7db   : > { %1575 = vmatmul.mubr.bf16.vlgmr.msra.gmra.mrb[24].mxu1 %v1349_v18  ;;  %1618 = vmatmul.mubr.bf16.vlgmr.msra.gmra.mrb[16].mxu0 %v1349_v18 }
 0x7dc   : > { %2180 = vmatpush3.bf16.msra.mxu1 %v2433_v21 }
 0x7dd   : > { %2181 = vmatprep.subr.bf16.mxu1 %v2434_v31 }
 0x7e0   : > { %2182 = vmatpush3.bf16.msra.mxu1 %v2435_v34 }
 0x7e1   : > { %2183 = vmatprep.subr.bf16.mxu1 %v2436_v43 }
 0x7e4   : > { %2184 = vmatpush3.bf16.msra.mxu1 %v2437_v44 }
 0x7e5   : > { %2185 = vmatprep.subr.bf16.mxu1 %v2438_v40  ;;  %v2124_v40 = vld [vmem:[%s3182_s8] ss:$0 sm:$0xff] (!%p2123_p10) }
 0x7e8   : > { %2186 = vmatpush3.bf16.msra.mxu1 %v2439_v22 }
 0x7e9   : > { %2187 = vmatprep.subr.bf16.mxu1 %v2440_v23 }
 0x7ec   : > { %2188 = vmatpush3.bf16.msra.mxu1 %v2441_v24 }
 0x7ed   : > { %2189 = vmatprep.subr.bf16.mxu1 %v2442_v25 }
 0x7f0   : > { %2190 = vmatpush3.bf16.msra.mxu1 %v2443_v26 }
 0x7f1   : > { %2191 = vmatprep.subr.bf16.mxu1 %v2444_v27 }
 0x7f4   : > { %2192 = vmatpush3.bf16.msra.mxu1 %v2445_v28 }
 0x7f5   : > { %2193 = vmatprep.subr.bf16.mxu1 %v2446_v29 }
 0x7f8   : > { %2194 = vmatpush3.bf16.msra.mxu1 %v2447_v30 }
 0x8ae   : > { %v1576_v32 = vpop.f32.mrb[24].mxu1  ;;  %v1619_v33 = vpop.f32.mrb[16].mxu0 }
 0x8af   : > { %v2101_v20 = vmul.f32 -1.442695, %v1576_v32  ;;  %v1578_v35 = vpop.f32.mrb[25].mxu1  ;;  %v1621_v36 = vpop.f32.mrb[17].mxu0 }
 0x8b0   : > { %v2102_v37 = vmul.f32 -1.442695, %v1578_v35  ;;  %v1580_v39 = vpop.f32.mrb[26].mxu1  ;;  %v1623_v57 = vpop.f32.mrb[18].mxu0 }
 0x8b1   : > { %2488 = vpow2.f32 %v2101_v20  ;;  %v2103_v41 = vmul.f32 -1.442695, %v1580_v39  ;;  %v1582_v45 = vpop.f32.mrb[27].mxu1  ;;  %v1625_v46 = vpop.f32.mrb[19].mxu0 }
 0x8b2   : > { %2490 = vpow2.f32 %v2102_v37  ;;  %v2104_v47 = vmul.f32 -1.442695, %v1582_v45 }
 0x8b3   : > { %2492 = vpow2.f32 %v2103_v41 }
 0x8b4   : > { %2494 = vpow2.f32 %v2104_v47 }
 0x8bb   : > { %v2489_v48 = vpop.eup %2488 }
 0x8bc   : > { %v2491_v49 = vpop.eup %2490  ;;  %v1640_v50 = vadd.f32 1.0, %v2489_v48 }
 0x8bd   : > { %v2493_v51 = vpop.eup %2492  ;;  %v1641_v52 = vadd.f32 1.0, %v2491_v49 }
 0x8be   : > { %v2495_v54 = vpop.eup %2494  ;;  %2496 = vrcp.f32 %v1640_v50  ;;  %v1642_v55 = vadd.f32 1.0, %v2493_v51 }
 0x8bf   : > { %2498 = vrcp.f32 %v1641_v52  ;;  %v1643_v56 = vadd.f32 1.0, %v2495_v54 }
 0x8c0   : > { %2500 = vrcp.f32 %v1642_v55 }
 0x8c1   : > { %2502 = vrcp.f32 %v1643_v56 }
 0x8c8   : > { %v2497_v58 = vpop.eup %2496 }
 0x8c9   : > { %v2499_v59 = vpop.eup %2498  ;;  %v1652_v60 = vmul.f32 %v2497_v58, %v1576_v32 }
 0x8ca   : > { %v2501_v61 = vpop.eup %2500  ;;  %v1653_v62 = vmul.f32 %v2499_v59, %v1578_v35 }
 0x8cb   : > { %v2503_v63 = vpop.eup %2502  ;;  %v1656_v0 = vmul.f32 %v1652_v60, %v1619_v33  ;;  %v1654_v1 = vmul.f32 %v2501_v61, %v1580_v39 }
 0x8cc   : > { %v1657_v2 = vmul.f32 %v1653_v62, %v1621_v36  ;;  %v1655_v3 = vmul.f32 %v2503_v63, %v1582_v45 }
 0x8cd   : > { %v1658_v4 = vmul.f32 %v1654_v1, %v1623_v57 }
 0x8ce   : > { %v1659_v5 = vmul.f32 %v1655_v3, %v1625_v46 }
 0x8cf   : > { %v1660_v6 = vpack.c.bf16 %v1658_v4, %v1656_v0 }
 0x8d0   : > { %v1661_v7 = vpack.c.bf16 %v1659_v5, %v1657_v2 }
 0x8d2   : > { %1822 = vmatprep.mubr.bf16.mxu1 %v1661_v7 }
 0x8d3   : > { %1823 = vmatmul.mubr.bf16.vlgmr.msra.gmra.mrb[28].mxu1 %v1660_v6 }
 0x9a6   : > { %v2195_v53 = vpop.f32.mrb[28].mxu1 }
 0x9a7   : > { %v2196_v8 = vpop.f32.mrb[29].mxu1 }
 0x9a8   : > { %v2197_v9 = vadd.f32 %v2196_v8, %v2195_v53  ;;  %v2198_v10 = vpop.f32.mrb[30].mxu1 }
 0x9a9   : > { %v2199_v11 = vpop.f32.mrb[31].mxu1 }
 0x9aa   : > { %v1831_v12 = vadd.f32 %v2197_v9, %v3081_v38  ;;  %v2200_v13 = vadd.f32 %v2199_v11, %v2198_v10  ;;  %1848 = sbr.rel (%p2123_p10) target bundleno = 2646 (0xa56), region = 72 }
 0x9ac   : > { %1833 = vst [vmem:[#allocation2] sm:$0xff] %v1831_v12  ;;  %v1832_v14 = vadd.f32 %v2200_v13, %v3083_v42  ;;  %v1850_v16 = vmul.f32 (!%p2123_p10), %v1831_v12, %v1831_v12 }
 0x9ae   : > { %1834 = vst [vmem:[#allocation2 + $0x8] sm:$0xff] %v1832_v14  ;;  %v2147_v15 = vpack.c.bf16 %v1832_v14, %v1831_v12  ;;  %1852 = vadd.xlane.f32.xlu0 (!%p2123_p10), %v1850_v16  ;;  %v1851_v17 = vmul.f32 (!%p2123_p10), %v1832_v14, %v1832_v14 }
 0x9b0   : > { %2148 = vst [vmem:[#allocation8] sm:$0xff] %v2147_v15  }
 0x9b2   : > { %1854 = vadd.xlane.f32.xlu0 %v1851_v17 }
 0xa3b   : > { %v1853_v18 = vpop.xlane.xlu0 %1852 }
 0xa3c   : > { %v1856_v19 = vmul.f32 0.0078125, %v1853_v18 }
 0xa3e   : > { %v1858_v21 = vadd.f32 1e-05, %v1856_v19 }
 0xa3f   : > { %v1855_v31 = vpop.xlane.xlu0 %1854 }
 0xa40   : > { %2506 = vrsqrt.f32 %v1858_v21  ;;  %v1857_v38 = vmul.f32 0.0078125, %v1855_v31 }
 0xa42   : > { %v1859_v34 = vadd.f32 1e-05, %v1857_v38 }
 0xa44   : > { %2508 = vrsqrt.f32 %v1859_v34 }
 0xa4a   : > { %v2507_v43 = vpop.eup %2506 }
 0xa4b   : > { %v1862_v42 = vmul.f32 %v2507_v43, %v1831_v12 }
 0xa4d   : > { %v1870_v23 = vmul.f32 %v2124_v40, %v1862_v42 }
 0xa4e   : > { %v2509_v44 = vpop.eup %2508 }
 0xa4f   : > { %v1863_v22 = vmul.f32 %v2509_v44, %v1832_v14 }
 0xa51   : > { %v1871_v24 = vmul.f32 %v2124_v40, %v1863_v22 }
 0xa53   : > { %v2152_v25 = vpack.c.bf16 %v1871_v24, %v1870_v23 }
 0xa55   : > { %2153 = vst [vmem:[#allocation8] sm:$0xff] %v2152_v25  }
 0xa56 PF: > { %p2290_p1 = scmp.eq.s32.totalorder %s2721_s13, 1  ;;  %s2650_s16 = smov [#allocation8]  }
 0xa57   : > { %s1888_s25 = sshll.u32 %s2650_s16, 4  ;;  %s1889_s25 = int_to_ptr.vmem [resolvable:$true] %s1888_s25 }
 0xa58   : > { %s2568_s27 = scalar_lea.vmem %s1889_s25, 128  ;;  %p2575_p12 = scmp.lt.s32.totalorder %s1889_s25, %s1889_s25 }
 0xa59   : > { %p2569_p4 = scmp.ne.s32.totalorder %s1889_s25, %s2568_s27  ;;  %p2576_p0 = scmp.lt.s32.totalorder %s2568_s27, %s2568_s27 }
 0xa5b   : > { %p2570_p5 = pnand %p2569_p4, %p2290_p1  ;;  %p2577_p2 = por %p2576_p0, %p2575_p12 }
 0xa5d   : > { %p2571_p8 = pneg %p2570_p5 }
 0xa5f   : > { %p2578_p13 = pnand %p2577_p2, %p2571_p8 }
 0xa61   : > { %2581 = shalt.err (!%p2578_p13)
}
 0xa62   : > { %s2582_s29 = scalar_lea.hbm %s3183_s9, 128 }
 0xa63   : > { %p2583_p11 = scmp.ne.s32.totalorder %s3183_s9, %s2582_s29  ;;  %p2588_p6 = scmp.lt.u32.totalorder %s2582_s29, %s3183_s9 }
 0xa65   : > { %p2584_p3 = pnand %p2583_p11, %p2290_p1 }
 0xa67   : > { %p2585_p7 = pneg %p2584_p3 }
 0xa69   : > { %p2590_p9 = pnand %p2588_p6, %p2585_p7 }
 0xa6b   : > { %2593 = shalt.err (!%p2590_p9)
}
 0xa6c   : > { %s2651_s15 = smov 4  }
 0xa6d   : > { %2276 = dma.vmem_to_hbm [thread:$0]  (%p2290_p1), %s1889_s25, 128, %s3183_s9, [#allocation5], %s2649_s26, %s2649_s26, %s2651_s15  }
 0xa6e   : > { %2619 = dma.done.wait (%p2290_p1), [#allocation5], 128  }
 0xa6f   : > { %2621 = vsyncadd (%p2290_p1), [#allocation5], 4294967168 }
 0xa70 PF: > { %s3206_s12 = sld [smem:[#allocation12_spill]]  ;;  %s3207_s30 = smov %s2628_s10 }
 0xa71   : > { %s3208_s10 = smov %s2632_s11  ;;  %s3209_s11 = smov %s2773_s24 }
 0xa76   : > { %p21_p10 = scmp.ge.s32.totalorder %s3206_s12, 4  }
 0xa78   :  { %23 = sbr.rel (!%p21_p10) target bundleno = 7 (0x7), region = 122 }
 0xa7f   :  { %1904 = vsyncpa [#allocation4], 1 }
 0xa80   :  { %1906 = vsyncpa [#allocation4 + $0x1], 1 }
 0xa81   :  { %1907 = vsyncpa [#allocation7], 1 }
 0xa82   :  { %1909 = vsyncpa [#allocation7 + $0x1], 1 }
 0xa83   :  { %1910 = vsyncpa [#allocation5], 1 }
 0xa84   :  { %1912 = vsyncpa [#allocation5 + $0x1], 1 }

</bundles_post_ra>
